<compile_context>
chip_gen: v7x
topology: tpu7x:2x2x1
jax: 0.10.0
libtpu: 0.0.40
codegen_flags: <defaults>
</compile_context>

<pallas_src>
import functools
import math

import jax
import jax.numpy as jnp
from jax.experimental import pallas as pl
from jax.experimental.pallas import tpu as pltpu


# ----------------------------- fused Pallas kernel -------------------------

def _fused_pn_kernel(
    ids_ref, word_emb_ref, pos_type_ref, emb_g_ref, emb_b_ref,
    wqkv_ref, bqkv_ref, wo_ref, bo_ref, ln1_g_ref, ln1_b_ref,
    w1_ref, b1_ref, w2_ref, b2_ref, ln2_g_ref, ln2_b_ref,
    fc_w_ref, fc_b_ref,
    o_ref,
    *, num_layers, num_heads, head_dim, eps):
    H = num_heads * head_dim
    S = pos_type_ref.shape[0]
    vocab = word_emb_ref.shape[0]
    scale = 1.0 / math.sqrt(head_dim)

    def layernorm(v, g, b):
        mean = jnp.mean(v, axis=-1, keepdims=True)
        var = jnp.mean(jnp.square(v - mean), axis=-1, keepdims=True)
        return (v - mean) * jax.lax.rsqrt(var + eps) * g + b

    def gelu(v):
        # TODO(synk): BERT uses exact erf-GELU; tanh approximation used in-kernel.
        c = math.sqrt(2.0 / math.pi)
        return 0.5 * v * (1.0 + jnp.tanh(c * (v + 0.044715 * v * v * v)))

    # ---- Embedding: one-hot gather on the MXU (fully in-kernel). ----------
    ids = ids_ref[0]                                   # [S, 1] int32
    one_hot = (ids == jax.lax.broadcasted_iota(jnp.int32, (S, vocab), 1)
               ).astype(jnp.float32)                   # [S, vocab]
    x = (jnp.dot(one_hot, word_emb_ref[...], preferred_element_type=jnp.float32)
         + pos_type_ref[...])                          # [S, H]
    x = layernorm(x, emb_g_ref[...], emb_b_ref[...])

    # ---- Encoder layers (static unroll). -----------------------------------
    for l in range(num_layers):
        # Fused Q|K|V projection: one [S,H] @ [H,3H] MXU pass.
        qkv = (jnp.dot(x, wqkv_ref[l], preferred_element_type=jnp.float32)
               + bqkv_ref[l])                          # [S, 3H]
        wo = wo_ref[l]                                 # [H, H]

        # Self-attention, all heads in-kernel (no mask: all positions valid).
        attn = jnp.zeros_like(x)                       # [S, H]
        for h in range(num_heads):                     # static unroll
            lo, hi = h * head_dim, (h + 1) * head_dim
            q_h = qkv[:, lo:hi]                        # [S, dh]
            k_h = qkv[:, H + lo:H + hi]                # [S, dh]
            v_h = qkv[:, 2 * H + lo:2 * H + hi]        # [S, dh]
            s = jnp.dot(q_h, k_h.T, preferred_element_type=jnp.float32) * scale
            s = s - jnp.max(s, axis=-1, keepdims=True)
            p = jnp.exp(s)
            p = p * pl.reciprocal(jnp.sum(p, axis=-1, keepdims=True), approx=True)
            ctx = jnp.dot(p, v_h, preferred_element_type=jnp.float32)  # [S, dh]
            # Head-merge folded into the output projection:
            #   concat_h(ctx_h) @ Wo  ==  sum_h ctx_h @ Wo[h*dh:(h+1)*dh, :]
            attn = attn + jnp.dot(ctx, wo[lo:hi, :],
                                  preferred_element_type=jnp.float32)
        attn = attn + bo_ref[l]

        # Residual + LN1, FFN, residual + LN2 — all in-register.
        x = layernorm(x + attn, ln1_g_ref[l], ln1_b_ref[l])
        ff = gelu(jnp.dot(x, w1_ref[l], preferred_element_type=jnp.float32)
                  + b1_ref[l])
        ff = jnp.dot(ff, w2_ref[l], preferred_element_type=jnp.float32) + b2_ref[l]
        x = layernorm(x + ff, ln2_g_ref[l], ln2_b_ref[l])

    # ---- Final Linear(H, 256) on the CLS row only; lane-dense store. -------
    cls = x[0:1, :]                                    # [1, H]
    out = (jnp.dot(cls, fc_w_ref[...], preferred_element_type=jnp.float32)
           + fc_b_ref[...])                            # [1, 256]
    o_ref[0] = out.astype(o_ref.dtype)


# ------------------------------ model wiring -------------------------------

class Cfg:
    vocab = 128
    hidden = 32
    heads = 4
    inter = 64
    layers = 2
    max_pos = 16
    type_vocab = 2
    fc_out = 256


def init_params(key, cfg):
    def norm(k, shape):
        return (0.02 * jax.random.normal(k, shape)).astype(jnp.float32)

    keys = iter(jax.random.split(key, 64))
    H, I, L = cfg.hidden, cfg.inter, cfg.layers
    return {
        "word_emb": norm(next(keys), (cfg.vocab, H)),
        "pos_emb": norm(next(keys), (cfg.max_pos, H)),
        "type_emb": norm(next(keys), (cfg.type_vocab, H)),
        "emb_ln_g": jnp.ones((1, H), jnp.float32),
        "emb_ln_b": jnp.zeros((1, H), jnp.float32),
        # Per-layer weights stacked on a leading layer axis; Q/K/V fused.
        "wqkv": norm(next(keys), (L, H, 3 * H)),
        "bqkv": jnp.zeros((L, 1, 3 * H), jnp.float32),
        "wo": norm(next(keys), (L, H, H)),
        "bo": jnp.zeros((L, 1, H), jnp.float32),
        "ln1_g": jnp.ones((L, 1, H), jnp.float32),
        "ln1_b": jnp.zeros((L, 1, H), jnp.float32),
        "w1": norm(next(keys), (L, H, I)),
        "b1": jnp.zeros((L, 1, I), jnp.float32),
        "w2": norm(next(keys), (L, I, H)),
        "b2": jnp.zeros((L, 1, H), jnp.float32),
        "ln2_g": jnp.ones((L, 1, H), jnp.float32),
        "ln2_b": jnp.zeros((L, 1, H), jnp.float32),
        "fc_w": norm(next(keys), (H, cfg.fc_out)),
        "fc_b": jnp.zeros((1, cfg.fc_out), jnp.float32),
    }


def pn_model_forward(params, ids, cfg):
    B, S = ids.shape
    H = cfg.hidden

    # Position + token_type(=0) embeddings depend only on weights/seq length;
    # fold them into a single constant [S, H] additive table.
    pos_type = params["pos_emb"][:S] + params["type_emb"][0][None, :]  # [S, H]

    # ids as [B, S, 1] so the kernel sees an [S, 1] int32 tile per batch elem.
    ids3 = ids.astype(jnp.int32).reshape(B, S, 1)

    def full(shape):
        return pl.BlockSpec(shape, lambda b, _n=len(shape): (0,) * _n)

    weight_names = ["word_emb", "emb_ln_g", "emb_ln_b",
                    "wqkv", "bqkv", "wo", "bo", "ln1_g", "ln1_b",
                    "w1", "b1", "w2", "b2", "ln2_g", "ln2_b",
                    "fc_w", "fc_b"]
    weights = {n: params[n] for n in weight_names}

    kernel = functools.partial(
        _fused_pn_kernel,
        num_layers=cfg.layers,
        num_heads=cfg.heads,
        head_dim=H // cfg.heads,
        eps=1e-12,
    )

    ordered = [weights["word_emb"], pos_type,
               weights["emb_ln_g"], weights["emb_ln_b"],
               weights["wqkv"], weights["bqkv"], weights["wo"], weights["bo"],
               weights["ln1_g"], weights["ln1_b"],
               weights["w1"], weights["b1"], weights["w2"], weights["b2"],
               weights["ln2_g"], weights["ln2_b"],
               weights["fc_w"], weights["fc_b"]]

    out = pl.pallas_call(
        kernel,
        out_shape=jax.ShapeDtypeStruct((B, 1, cfg.fc_out), jnp.float32),
        grid=(B,),
        in_specs=[pl.BlockSpec((1, S, 1), lambda b: (b, 0, 0))]
                 + [full(w.shape) for w in ordered],
        out_specs=pl.BlockSpec((1, 1, cfg.fc_out), lambda b: (b, 0, 0)),
        compiler_params=pltpu.CompilerParams(
            dimension_semantics=("parallel",)),
    )(ids3, *ordered)
    return out.reshape(B, cfg.fc_out)


if __name__ == "__main__":
    cfg = Cfg()
    key = jax.random.PRNGKey(0)
    pkey, dkey = jax.random.split(key)
    params = init_params(pkey, cfg)

    B, S = 2, 8
    ids = jax.random.randint(dkey, (B, S), 0, cfg.vocab, dtype=jnp.int32)

    fwd = jax.jit(functools.partial(pn_model_forward, cfg=cfg))
    out = fwd(params, ids)
    jax.block_until_ready(out)
    assert out.shape == (B, cfg.fc_out) and out.dtype == jnp.float32
    print("KERNEL_OK")
</pallas_src>

<mosaic_0001>
module attributes {stable_mosaic.version = 11 : i64} {
  func.func @_fused_pn_kernel(%arg0: i32, %arg1: memref<1x8x1xi32, #tpu.memory_space<vmem>>, %arg2: memref<128x32xf32, #tpu.memory_space<vmem>>, %arg3: memref<8x32xf32, #tpu.memory_space<vmem>>, %arg4: memref<1x32xf32, #tpu.memory_space<vmem>>, %arg5: memref<1x32xf32, #tpu.memory_space<vmem>>, %arg6: memref<2x32x96xf32, #tpu.memory_space<vmem>>, %arg7: memref<2x1x96xf32, #tpu.memory_space<vmem>>, %arg8: memref<2x32x32xf32, #tpu.memory_space<vmem>>, %arg9: memref<2x1x32xf32, #tpu.memory_space<vmem>>, %arg10: memref<2x1x32xf32, #tpu.memory_space<vmem>>, %arg11: memref<2x1x32xf32, #tpu.memory_space<vmem>>, %arg12: memref<2x32x64xf32, #tpu.memory_space<vmem>>, %arg13: memref<2x1x64xf32, #tpu.memory_space<vmem>>, %arg14: memref<2x64x32xf32, #tpu.memory_space<vmem>>, %arg15: memref<2x1x32xf32, #tpu.memory_space<vmem>>, %arg16: memref<2x1x32xf32, #tpu.memory_space<vmem>>, %arg17: memref<2x1x32xf32, #tpu.memory_space<vmem>>, %arg18: memref<32x256xf32, #tpu.memory_space<vmem>>, %arg19: memref<1x256xf32, #tpu.memory_space<vmem>>, %arg20: memref<1x1x256xf32, #tpu.memory_space<vmem>>) attributes {dimension_semantics = [#tpu.dimension_semantics<parallel>], iteration_bounds = array<i64: 2>, scalar_prefetch = 0 : i64, scratch_operands = 0 : i64, tpu.core_type = #tpu.core_type<tc>, window_params = [{transform_indices = @transform_0, window_bounds = array<i64: 1, 8, 1>}, {pipeline_mode = #tpu.pipeline_mode<synchronous>, transform_indices = @transform_1, window_bounds = array<i64: 128, 32>}, {pipeline_mode = #tpu.pipeline_mode<synchronous>, transform_indices = @transform_2, window_bounds = array<i64: 8, 32>}, {pipeline_mode = #tpu.pipeline_mode<synchronous>, transform_indices = @transform_3, window_bounds = array<i64: 1, 32>}, {pipeline_mode = #tpu.pipeline_mode<synchronous>, transform_indices = @transform_4, window_bounds = array<i64: 1, 32>}, {pipeline_mode = #tpu.pipeline_mode<synchronous>, transform_indices = @transform_5, window_bounds = array<i64: 2, 32, 96>}, {pipeline_mode = #tpu.pipeline_mode<synchronous>, transform_indices = @transform_6, window_bounds = array<i64: 2, 1, 96>}, {pipeline_mode = #tpu.pipeline_mode<synchronous>, transform_indices = @transform_7, window_bounds = array<i64: 2, 32, 32>}, {pipeline_mode = #tpu.pipeline_mode<synchronous>, transform_indices = @transform_8, window_bounds = array<i64: 2, 1, 32>}, {pipeline_mode = #tpu.pipeline_mode<synchronous>, transform_indices = @transform_9, window_bounds = array<i64: 2, 1, 32>}, {pipeline_mode = #tpu.pipeline_mode<synchronous>, transform_indices = @transform_10, window_bounds = array<i64: 2, 1, 32>}, {pipeline_mode = #tpu.pipeline_mode<synchronous>, transform_indices = @transform_11, window_bounds = array<i64: 2, 32, 64>}, {pipeline_mode = #tpu.pipeline_mode<synchronous>, transform_indices = @transform_12, window_bounds = array<i64: 2, 1, 64>}, {pipeline_mode = #tpu.pipeline_mode<synchronous>, transform_indices = @transform_13, window_bounds = array<i64: 2, 64, 32>}, {pipeline_mode = #tpu.pipeline_mode<synchronous>, transform_indices = @transform_14, window_bounds = array<i64: 2, 1, 32>}, {pipeline_mode = #tpu.pipeline_mode<synchronous>, transform_indices = @transform_15, window_bounds = array<i64: 2, 1, 32>}, {pipeline_mode = #tpu.pipeline_mode<synchronous>, transform_indices = @transform_16, window_bounds = array<i64: 2, 1, 32>}, {pipeline_mode = #tpu.pipeline_mode<synchronous>, transform_indices = @transform_17, window_bounds = array<i64: 32, 256>}, {pipeline_mode = #tpu.pipeline_mode<synchronous>, transform_indices = @transform_18, window_bounds = array<i64: 1, 256>}, {transform_indices = @transform_19, window_bounds = array<i64: 1, 1, 256>}]} {
    %c0 = arith.constant 0 : index
    %c0_0 = arith.constant 0 : index
    %c0_1 = arith.constant 0 : index
    %0 = vector.load %arg1[%c0, %c0_0, %c0_1] : memref<1x8x1xi32, #tpu.memory_space<vmem>>, vector<1x8x1xi32>
    %1 = vector.shape_cast %0 : vector<1x8x1xi32> to vector<8x1xi32>
    %2 = tpu.iota {dimensions = array<i32: 1>} : vector<8x128xi32>
    %3 = vector.broadcast %1 : vector<8x1xi32> to vector<8x128xi32>
    %4 = arith.cmpi eq, %3, %2 : vector<8x128xi32>
    %5 = arith.extui %4 : vector<8x128xi1> to vector<8x128xi32>
    %6 = arith.sitofp %5 : vector<8x128xi32> to vector<8x128xf32>
    %c0_2 = arith.constant 0 : index
    %c0_3 = arith.constant 0 : index
    %7 = vector.load %arg2[%c0_2, %c0_3] : memref<128x32xf32, #tpu.memory_space<vmem>>, vector<128x32xf32>
    %cst = arith.constant dense<0.000000e+00> : vector<8x32xf32>
    %8 = tpu.matmul %6, %7, %cst {dimension_numbers = #tpu.dot_dimension_numbers<[1], [0], [0], [1], [0, 0, 1, 1], [], []>} : vector<8x128xf32>, vector<128x32xf32>, vector<8x32xf32> -> vector<8x32xf32>
    %c0_4 = arith.constant 0 : index
    %c0_5 = arith.constant 0 : index
    %9 = vector.load %arg3[%c0_4, %c0_5] : memref<8x32xf32, #tpu.memory_space<vmem>>, vector<8x32xf32>
    %10 = arith.addf %8, %9 : vector<8x32xf32>
    %c0_6 = arith.constant 0 : index
    %c0_7 = arith.constant 0 : index
    %11 = vector.load %arg4[%c0_6, %c0_7] : memref<1x32xf32, #tpu.memory_space<vmem>>, vector<1x32xf32>
    %c0_8 = arith.constant 0 : index
    %c0_9 = arith.constant 0 : index
    %12 = vector.load %arg5[%c0_8, %c0_9] : memref<1x32xf32, #tpu.memory_space<vmem>>, vector<1x32xf32>
    %cst_10 = arith.constant dense<0.000000e+00> : vector<8xf32>
    %13 = vector.multi_reduction <add>, %10, %cst_10 [1] : vector<8x32xf32> to vector<8xf32>
    %14 = vector.shape_cast %13 : vector<8xf32> to vector<8x1xf32>
    %cst_11 = arith.constant 3.200000e+01 : f32
    %15 = vector.broadcast %cst_11 : f32 to vector<8x1xf32>
    %16 = arith.divf %14, %15 : vector<8x1xf32>
    %17 = vector.broadcast %16 : vector<8x1xf32> to vector<8x32xf32>
    %18 = arith.subf %10, %17 : vector<8x32xf32>
    %19 = arith.mulf %18, %18 : vector<8x32xf32>
    %cst_12 = arith.constant dense<0.000000e+00> : vector<8xf32>
    %20 = vector.multi_reduction <add>, %19, %cst_12 [1] : vector<8x32xf32> to vector<8xf32>
    %21 = vector.shape_cast %20 : vector<8xf32> to vector<8x1xf32>
    %cst_13 = arith.constant 3.200000e+01 : f32
    %22 = vector.broadcast %cst_13 : f32 to vector<8x1xf32>
    %23 = arith.divf %21, %22 : vector<8x1xf32>
    %24 = vector.broadcast %16 : vector<8x1xf32> to vector<8x32xf32>
    %25 = arith.subf %10, %24 : vector<8x32xf32>
    %cst_14 = arith.constant 9.99999996E-13 : f32
    %26 = vector.broadcast %cst_14 : f32 to vector<8x1xf32>
    %27 = arith.addf %23, %26 : vector<8x1xf32>
    %28 = math.rsqrt %27 : vector<8x1xf32>
    %29 = vector.broadcast %28 : vector<8x1xf32> to vector<8x32xf32>
    %30 = arith.mulf %25, %29 : vector<8x32xf32>
    %31 = vector.broadcast %11 : vector<1x32xf32> to vector<8x32xf32>
    %32 = arith.mulf %30, %31 : vector<8x32xf32>
    %33 = vector.broadcast %12 : vector<1x32xf32> to vector<8x32xf32>
    %34 = arith.addf %32, %33 : vector<8x32xf32>
    %c0_15 = arith.constant 0 : index
    %c0_16 = arith.constant 0 : index
    %c0_17 = arith.constant 0 : index
    %35 = vector.load %arg6[%c0_15, %c0_16, %c0_17] : memref<2x32x96xf32, #tpu.memory_space<vmem>>, vector<1x32x96xf32>
    %36 = vector.shape_cast %35 : vector<1x32x96xf32> to vector<32x96xf32>
    %cst_18 = arith.constant dense<0.000000e+00> : vector<8x96xf32>
    %37 = tpu.matmul %34, %36, %cst_18 {dimension_numbers = #tpu.dot_dimension_numbers<[1], [0], [0], [1], [0, 0, 1, 1], [], []>} : vector<8x32xf32>, vector<32x96xf32>, vector<8x96xf32> -> vector<8x96xf32>
    %c0_19 = arith.constant 0 : index
    %c0_20 = arith.constant 0 : index
    %c0_21 = arith.constant 0 : index
    %38 = vector.load %arg7[%c0_19, %c0_20, %c0_21] : memref<2x1x96xf32, #tpu.memory_space<vmem>>, vector<1x1x96xf32>
    %39 = vector.shape_cast %38 : vector<1x1x96xf32> to vector<1x96xf32>
    %40 = vector.broadcast %39 : vector<1x96xf32> to vector<8x96xf32>
    %41 = arith.addf %37, %40 : vector<8x96xf32>
    %c0_22 = arith.constant 0 : index
    %c0_23 = arith.constant 0 : index
    %c0_24 = arith.constant 0 : index
    %42 = vector.load %arg8[%c0_22, %c0_23, %c0_24] : memref<2x32x32xf32, #tpu.memory_space<vmem>>, vector<1x32x32xf32>
    %43 = vector.shape_cast %42 : vector<1x32x32xf32> to vector<32x32xf32>
    %cst_25 = arith.constant 0.000000e+00 : f32
    %44 = vector.broadcast %cst_25 : f32 to vector<8x32xf32>
    %45 = vector.extract_strided_slice %41 {offsets = [0, 0], sizes = [8, 8], strides = [1, 1]} : vector<8x96xf32> to vector<8x8xf32>
    %46 = vector.extract_strided_slice %41 {offsets = [0, 32], sizes = [8, 8], strides = [1, 1]} : vector<8x96xf32> to vector<8x8xf32>
    %47 = vector.extract_strided_slice %41 {offsets = [0, 64], sizes = [8, 8], strides = [1, 1]} : vector<8x96xf32> to vector<8x8xf32>
    %48 = tpu.transpose %46, [1, 0] : vector<8x8xf32> -> vector<8x8xf32>
    %cst_26 = arith.constant dense<0.000000e+00> : vector<8x8xf32>
    %49 = tpu.matmul %45, %48, %cst_26 {dimension_numbers = #tpu.dot_dimension_numbers<[1], [0], [0], [1], [0, 0, 1, 1], [], []>} : vector<8x8xf32>, vector<8x8xf32>, vector<8x8xf32> -> vector<8x8xf32>
    %cst_27 = arith.constant 0.353553385 : f32
    %50 = vector.broadcast %cst_27 : f32 to vector<8x8xf32>
    %51 = arith.mulf %49, %50 : vector<8x8xf32>
    %cst_28 = arith.constant dense<0xFF800000> : vector<8xf32>
    %52 = vector.multi_reduction <maximumf>, %51, %cst_28 [1] : vector<8x8xf32> to vector<8xf32>
    %53 = vector.shape_cast %52 : vector<8xf32> to vector<8x1xf32>
    %54 = vector.broadcast %53 : vector<8x1xf32> to vector<8x8xf32>
    %55 = arith.subf %51, %54 : vector<8x8xf32>
    %56 = math.exp %55 : vector<8x8xf32>
    %cst_29 = arith.constant dense<0.000000e+00> : vector<8xf32>
    %57 = vector.multi_reduction <add>, %56, %cst_29 [1] : vector<8x8xf32> to vector<8xf32>
    %58 = vector.shape_cast %57 : vector<8xf32> to vector<8x1xf32>
    %59 = tpu.reciprocal %58 {approx = true} : vector<8x1xf32> -> vector<8x1xf32>
    %60 = vector.broadcast %59 : vector<8x1xf32> to vector<8x8xf32>
    %61 = arith.mulf %56, %60 : vector<8x8xf32>
    %cst_30 = arith.constant dense<0.000000e+00> : vector<8x8xf32>
    %62 = tpu.matmul %61, %47, %cst_30 {dimension_numbers = #tpu.dot_dimension_numbers<[1], [0], [0], [1], [0, 0, 1, 1], [], []>} : vector<8x8xf32>, vector<8x8xf32>, vector<8x8xf32> -> vector<8x8xf32>
    %63 = vector.extract_strided_slice %43 {offsets = [0, 0], sizes = [8, 32], strides = [1, 1]} : vector<32x32xf32> to vector<8x32xf32>
    %cst_31 = arith.constant dense<0.000000e+00> : vector<8x32xf32>
    %64 = tpu.matmul %62, %63, %cst_31 {dimension_numbers = #tpu.dot_dimension_numbers<[1], [0], [0], [1], [0, 0, 1, 1], [], []>} : vector<8x8xf32>, vector<8x32xf32>, vector<8x32xf32> -> vector<8x32xf32>
    %65 = arith.addf %44, %64 : vector<8x32xf32>
    %66 = vector.extract_strided_slice %41 {offsets = [0, 8], sizes = [8, 8], strides = [1, 1]} : vector<8x96xf32> to vector<8x8xf32>
    %67 = vector.extract_strided_slice %41 {offsets = [0, 40], sizes = [8, 8], strides = [1, 1]} : vector<8x96xf32> to vector<8x8xf32>
    %68 = vector.extract_strided_slice %41 {offsets = [0, 72], sizes = [8, 8], strides = [1, 1]} : vector<8x96xf32> to vector<8x8xf32>
    %69 = tpu.transpose %67, [1, 0] : vector<8x8xf32> -> vector<8x8xf32>
    %cst_32 = arith.constant dense<0.000000e+00> : vector<8x8xf32>
    %70 = tpu.matmul %66, %69, %cst_32 {dimension_numbers = #tpu.dot_dimension_numbers<[1], [0], [0], [1], [0, 0, 1, 1], [], []>} : vector<8x8xf32>, vector<8x8xf32>, vector<8x8xf32> -> vector<8x8xf32>
    %cst_33 = arith.constant 0.353553385 : f32
    %71 = vector.broadcast %cst_33 : f32 to vector<8x8xf32>
    %72 = arith.mulf %70, %71 : vector<8x8xf32>
    %cst_34 = arith.constant dense<0xFF800000> : vector<8xf32>
    %73 = vector.multi_reduction <maximumf>, %72, %cst_34 [1] : vector<8x8xf32> to vector<8xf32>
    %74 = vector.shape_cast %73 : vector<8xf32> to vector<8x1xf32>
    %75 = vector.broadcast %74 : vector<8x1xf32> to vector<8x8xf32>
    %76 = arith.subf %72, %75 : vector<8x8xf32>
    %77 = math.exp %76 : vector<8x8xf32>
    %cst_35 = arith.constant dense<0.000000e+00> : vector<8xf32>
    %78 = vector.multi_reduction <add>, %77, %cst_35 [1] : vector<8x8xf32> to vector<8xf32>
    %79 = vector.shape_cast %78 : vector<8xf32> to vector<8x1xf32>
    %80 = tpu.reciprocal %79 {approx = true} : vector<8x1xf32> -> vector<8x1xf32>
    %81 = vector.broadcast %80 : vector<8x1xf32> to vector<8x8xf32>
    %82 = arith.mulf %77, %81 : vector<8x8xf32>
    %cst_36 = arith.constant dense<0.000000e+00> : vector<8x8xf32>
    %83 = tpu.matmul %82, %68, %cst_36 {dimension_numbers = #tpu.dot_dimension_numbers<[1], [0], [0], [1], [0, 0, 1, 1], [], []>} : vector<8x8xf32>, vector<8x8xf32>, vector<8x8xf32> -> vector<8x8xf32>
    %84 = vector.extract_strided_slice %43 {offsets = [8, 0], sizes = [8, 32], strides = [1, 1]} : vector<32x32xf32> to vector<8x32xf32>
    %cst_37 = arith.constant dense<0.000000e+00> : vector<8x32xf32>
    %85 = tpu.matmul %83, %84, %cst_37 {dimension_numbers = #tpu.dot_dimension_numbers<[1], [0], [0], [1], [0, 0, 1, 1], [], []>} : vector<8x8xf32>, vector<8x32xf32>, vector<8x32xf32> -> vector<8x32xf32>
    %86 = arith.addf %65, %85 : vector<8x32xf32>
    %87 = vector.extract_strided_slice %41 {offsets = [0, 16], sizes = [8, 8], strides = [1, 1]} : vector<8x96xf32> to vector<8x8xf32>
    %88 = vector.extract_strided_slice %41 {offsets = [0, 48], sizes = [8, 8], strides = [1, 1]} : vector<8x96xf32> to vector<8x8xf32>
    %89 = vector.extract_strided_slice %41 {offsets = [0, 80], sizes = [8, 8], strides = [1, 1]} : vector<8x96xf32> to vector<8x8xf32>
    %90 = tpu.transpose %88, [1, 0] : vector<8x8xf32> -> vector<8x8xf32>
    %cst_38 = arith.constant dense<0.000000e+00> : vector<8x8xf32>
    %91 = tpu.matmul %87, %90, %cst_38 {dimension_numbers = #tpu.dot_dimension_numbers<[1], [0], [0], [1], [0, 0, 1, 1], [], []>} : vector<8x8xf32>, vector<8x8xf32>, vector<8x8xf32> -> vector<8x8xf32>
    %cst_39 = arith.constant 0.353553385 : f32
    %92 = vector.broadcast %cst_39 : f32 to vector<8x8xf32>
    %93 = arith.mulf %91, %92 : vector<8x8xf32>
    %cst_40 = arith.constant dense<0xFF800000> : vector<8xf32>
    %94 = vector.multi_reduction <maximumf>, %93, %cst_40 [1] : vector<8x8xf32> to vector<8xf32>
    %95 = vector.shape_cast %94 : vector<8xf32> to vector<8x1xf32>
    %96 = vector.broadcast %95 : vector<8x1xf32> to vector<8x8xf32>
    %97 = arith.subf %93, %96 : vector<8x8xf32>
    %98 = math.exp %97 : vector<8x8xf32>
    %cst_41 = arith.constant dense<0.000000e+00> : vector<8xf32>
    %99 = vector.multi_reduction <add>, %98, %cst_41 [1] : vector<8x8xf32> to vector<8xf32>
    %100 = vector.shape_cast %99 : vector<8xf32> to vector<8x1xf32>
    %101 = tpu.reciprocal %100 {approx = true} : vector<8x1xf32> -> vector<8x1xf32>
    %102 = vector.broadcast %101 : vector<8x1xf32> to vector<8x8xf32>
    %103 = arith.mulf %98, %102 : vector<8x8xf32>
    %cst_42 = arith.constant dense<0.000000e+00> : vector<8x8xf32>
    %104 = tpu.matmul %103, %89, %cst_42 {dimension_numbers = #tpu.dot_dimension_numbers<[1], [0], [0], [1], [0, 0, 1, 1], [], []>} : vector<8x8xf32>, vector<8x8xf32>, vector<8x8xf32> -> vector<8x8xf32>
    %105 = vector.extract_strided_slice %43 {offsets = [16, 0], sizes = [8, 32], strides = [1, 1]} : vector<32x32xf32> to vector<8x32xf32>
    %cst_43 = arith.constant dense<0.000000e+00> : vector<8x32xf32>
    %106 = tpu.matmul %104, %105, %cst_43 {dimension_numbers = #tpu.dot_dimension_numbers<[1], [0], [0], [1], [0, 0, 1, 1], [], []>} : vector<8x8xf32>, vector<8x32xf32>, vector<8x32xf32> -> vector<8x32xf32>
    %107 = arith.addf %86, %106 : vector<8x32xf32>
    %108 = vector.extract_strided_slice %41 {offsets = [0, 24], sizes = [8, 8], strides = [1, 1]} : vector<8x96xf32> to vector<8x8xf32>
    %109 = vector.extract_strided_slice %41 {offsets = [0, 56], sizes = [8, 8], strides = [1, 1]} : vector<8x96xf32> to vector<8x8xf32>
    %110 = vector.extract_strided_slice %41 {offsets = [0, 88], sizes = [8, 8], strides = [1, 1]} : vector<8x96xf32> to vector<8x8xf32>
    %111 = tpu.transpose %109, [1, 0] : vector<8x8xf32> -> vector<8x8xf32>
    %cst_44 = arith.constant dense<0.000000e+00> : vector<8x8xf32>
    %112 = tpu.matmul %108, %111, %cst_44 {dimension_numbers = #tpu.dot_dimension_numbers<[1], [0], [0], [1], [0, 0, 1, 1], [], []>} : vector<8x8xf32>, vector<8x8xf32>, vector<8x8xf32> -> vector<8x8xf32>
    %cst_45 = arith.constant 0.353553385 : f32
    %113 = vector.broadcast %cst_45 : f32 to vector<8x8xf32>
    %114 = arith.mulf %112, %113 : vector<8x8xf32>
    %cst_46 = arith.constant dense<0xFF800000> : vector<8xf32>
    %115 = vector.multi_reduction <maximumf>, %114, %cst_46 [1] : vector<8x8xf32> to vector<8xf32>
    %116 = vector.shape_cast %115 : vector<8xf32> to vector<8x1xf32>
    %117 = vector.broadcast %116 : vector<8x1xf32> to vector<8x8xf32>
    %118 = arith.subf %114, %117 : vector<8x8xf32>
    %119 = math.exp %118 : vector<8x8xf32>
    %cst_47 = arith.constant dense<0.000000e+00> : vector<8xf32>
    %120 = vector.multi_reduction <add>, %119, %cst_47 [1] : vector<8x8xf32> to vector<8xf32>
    %121 = vector.shape_cast %120 : vector<8xf32> to vector<8x1xf32>
    %122 = tpu.reciprocal %121 {approx = true} : vector<8x1xf32> -> vector<8x1xf32>
    %123 = vector.broadcast %122 : vector<8x1xf32> to vector<8x8xf32>
    %124 = arith.mulf %119, %123 : vector<8x8xf32>
    %cst_48 = arith.constant dense<0.000000e+00> : vector<8x8xf32>
    %125 = tpu.matmul %124, %110, %cst_48 {dimension_numbers = #tpu.dot_dimension_numbers<[1], [0], [0], [1], [0, 0, 1, 1], [], []>} : vector<8x8xf32>, vector<8x8xf32>, vector<8x8xf32> -> vector<8x8xf32>
    %126 = vector.extract_strided_slice %43 {offsets = [24, 0], sizes = [8, 32], strides = [1, 1]} : vector<32x32xf32> to vector<8x32xf32>
    %cst_49 = arith.constant dense<0.000000e+00> : vector<8x32xf32>
    %127 = tpu.matmul %125, %126, %cst_49 {dimension_numbers = #tpu.dot_dimension_numbers<[1], [0], [0], [1], [0, 0, 1, 1], [], []>} : vector<8x8xf32>, vector<8x32xf32>, vector<8x32xf32> -> vector<8x32xf32>
    %128 = arith.addf %107, %127 : vector<8x32xf32>
    %c0_50 = arith.constant 0 : index
    %c0_51 = arith.constant 0 : index
    %c0_52 = arith.constant 0 : index
    %129 = vector.load %arg9[%c0_50, %c0_51, %c0_52] : memref<2x1x32xf32, #tpu.memory_space<vmem>>, vector<1x1x32xf32>
    %130 = vector.shape_cast %129 : vector<1x1x32xf32> to vector<1x32xf32>
    %131 = vector.broadcast %130 : vector<1x32xf32> to vector<8x32xf32>
    %132 = arith.addf %128, %131 : vector<8x32xf32>
    %133 = arith.addf %34, %132 : vector<8x32xf32>
    %c0_53 = arith.constant 0 : index
    %c0_54 = arith.constant 0 : index
    %c0_55 = arith.constant 0 : index
    %134 = vector.load %arg10[%c0_53, %c0_54, %c0_55] : memref<2x1x32xf32, #tpu.memory_space<vmem>>, vector<1x1x32xf32>
    %135 = vector.shape_cast %134 : vector<1x1x32xf32> to vector<1x32xf32>
    %c0_56 = arith.constant 0 : index
    %c0_57 = arith.constant 0 : index
    %c0_58 = arith.constant 0 : index
    %136 = vector.load %arg11[%c0_56, %c0_57, %c0_58] : memref<2x1x32xf32, #tpu.memory_space<vmem>>, vector<1x1x32xf32>
    %137 = vector.shape_cast %136 : vector<1x1x32xf32> to vector<1x32xf32>
    %cst_59 = arith.constant dense<0.000000e+00> : vector<8xf32>
    %138 = vector.multi_reduction <add>, %133, %cst_59 [1] : vector<8x32xf32> to vector<8xf32>
    %139 = vector.shape_cast %138 : vector<8xf32> to vector<8x1xf32>
    %cst_60 = arith.constant 3.200000e+01 : f32
    %140 = vector.broadcast %cst_60 : f32 to vector<8x1xf32>
    %141 = arith.divf %139, %140 : vector<8x1xf32>
    %142 = vector.broadcast %141 : vector<8x1xf32> to vector<8x32xf32>
    %143 = arith.subf %133, %142 : vector<8x32xf32>
    %144 = arith.mulf %143, %143 : vector<8x32xf32>
    %cst_61 = arith.constant dense<0.000000e+00> : vector<8xf32>
    %145 = vector.multi_reduction <add>, %144, %cst_61 [1] : vector<8x32xf32> to vector<8xf32>
    %146 = vector.shape_cast %145 : vector<8xf32> to vector<8x1xf32>
    %cst_62 = arith.constant 3.200000e+01 : f32
    %147 = vector.broadcast %cst_62 : f32 to vector<8x1xf32>
    %148 = arith.divf %146, %147 : vector<8x1xf32>
    %149 = vector.broadcast %141 : vector<8x1xf32> to vector<8x32xf32>
    %150 = arith.subf %133, %149 : vector<8x32xf32>
    %cst_63 = arith.constant 9.99999996E-13 : f32
    %151 = vector.broadcast %cst_63 : f32 to vector<8x1xf32>
    %152 = arith.addf %148, %151 : vector<8x1xf32>
    %153 = math.rsqrt %152 : vector<8x1xf32>
    %154 = vector.broadcast %153 : vector<8x1xf32> to vector<8x32xf32>
    %155 = arith.mulf %150, %154 : vector<8x32xf32>
    %156 = vector.broadcast %135 : vector<1x32xf32> to vector<8x32xf32>
    %157 = arith.mulf %155, %156 : vector<8x32xf32>
    %158 = vector.broadcast %137 : vector<1x32xf32> to vector<8x32xf32>
    %159 = arith.addf %157, %158 : vector<8x32xf32>
    %c0_64 = arith.constant 0 : index
    %c0_65 = arith.constant 0 : index
    %c0_66 = arith.constant 0 : index
    %160 = vector.load %arg12[%c0_64, %c0_65, %c0_66] : memref<2x32x64xf32, #tpu.memory_space<vmem>>, vector<1x32x64xf32>
    %161 = vector.shape_cast %160 : vector<1x32x64xf32> to vector<32x64xf32>
    %cst_67 = arith.constant dense<0.000000e+00> : vector<8x64xf32>
    %162 = tpu.matmul %159, %161, %cst_67 {dimension_numbers = #tpu.dot_dimension_numbers<[1], [0], [0], [1], [0, 0, 1, 1], [], []>} : vector<8x32xf32>, vector<32x64xf32>, vector<8x64xf32> -> vector<8x64xf32>
    %c0_68 = arith.constant 0 : index
    %c0_69 = arith.constant 0 : index
    %c0_70 = arith.constant 0 : index
    %163 = vector.load %arg13[%c0_68, %c0_69, %c0_70] : memref<2x1x64xf32, #tpu.memory_space<vmem>>, vector<1x1x64xf32>
    %164 = vector.shape_cast %163 : vector<1x1x64xf32> to vector<1x64xf32>
    %165 = vector.broadcast %164 : vector<1x64xf32> to vector<8x64xf32>
    %166 = arith.addf %162, %165 : vector<8x64xf32>
    %cst_71 = arith.constant 5.000000e-01 : f32
    %167 = vector.broadcast %cst_71 : f32 to vector<8x64xf32>
    %168 = arith.mulf %167, %166 : vector<8x64xf32>
    %cst_72 = arith.constant 4.471500e-02 : f32
    %169 = vector.broadcast %cst_72 : f32 to vector<8x64xf32>
    %170 = arith.mulf %169, %166 : vector<8x64xf32>
    %171 = arith.mulf %170, %166 : vector<8x64xf32>
    %172 = arith.mulf %171, %166 : vector<8x64xf32>
    %173 = arith.addf %166, %172 : vector<8x64xf32>
    %cst_73 = arith.constant 0.797884583 : f32
    %174 = vector.broadcast %cst_73 : f32 to vector<8x64xf32>
    %175 = arith.mulf %174, %173 : vector<8x64xf32>
    %176 = math.tanh %175 : vector<8x64xf32>
    %cst_74 = arith.constant 1.000000e+00 : f32
    %177 = vector.broadcast %cst_74 : f32 to vector<8x64xf32>
    %178 = arith.addf %177, %176 : vector<8x64xf32>
    %179 = arith.mulf %168, %178 : vector<8x64xf32>
    %c0_75 = arith.constant 0 : index
    %c0_76 = arith.constant 0 : index
    %c0_77 = arith.constant 0 : index
    %180 = vector.load %arg14[%c0_75, %c0_76, %c0_77] : memref<2x64x32xf32, #tpu.memory_space<vmem>>, vector<1x64x32xf32>
    %181 = vector.shape_cast %180 : vector<1x64x32xf32> to vector<64x32xf32>
    %cst_78 = arith.constant dense<0.000000e+00> : vector<8x32xf32>
    %182 = tpu.matmul %179, %181, %cst_78 {dimension_numbers = #tpu.dot_dimension_numbers<[1], [0], [0], [1], [0, 0, 1, 1], [], []>} : vector<8x64xf32>, vector<64x32xf32>, vector<8x32xf32> -> vector<8x32xf32>
    %c0_79 = arith.constant 0 : index
    %c0_80 = arith.constant 0 : index
    %c0_81 = arith.constant 0 : index
    %183 = vector.load %arg15[%c0_79, %c0_80, %c0_81] : memref<2x1x32xf32, #tpu.memory_space<vmem>>, vector<1x1x32xf32>
    %184 = vector.shape_cast %183 : vector<1x1x32xf32> to vector<1x32xf32>
    %185 = vector.broadcast %184 : vector<1x32xf32> to vector<8x32xf32>
    %186 = arith.addf %182, %185 : vector<8x32xf32>
    %187 = arith.addf %159, %186 : vector<8x32xf32>
    %c0_82 = arith.constant 0 : index
    %c0_83 = arith.constant 0 : index
    %c0_84 = arith.constant 0 : index
    %188 = vector.load %arg16[%c0_82, %c0_83, %c0_84] : memref<2x1x32xf32, #tpu.memory_space<vmem>>, vector<1x1x32xf32>
    %189 = vector.shape_cast %188 : vector<1x1x32xf32> to vector<1x32xf32>
    %c0_85 = arith.constant 0 : index
    %c0_86 = arith.constant 0 : index
    %c0_87 = arith.constant 0 : index
    %190 = vector.load %arg17[%c0_85, %c0_86, %c0_87] : memref<2x1x32xf32, #tpu.memory_space<vmem>>, vector<1x1x32xf32>
    %191 = vector.shape_cast %190 : vector<1x1x32xf32> to vector<1x32xf32>
    %cst_88 = arith.constant dense<0.000000e+00> : vector<8xf32>
    %192 = vector.multi_reduction <add>, %187, %cst_88 [1] : vector<8x32xf32> to vector<8xf32>
    %193 = vector.shape_cast %192 : vector<8xf32> to vector<8x1xf32>
    %cst_89 = arith.constant 3.200000e+01 : f32
    %194 = vector.broadcast %cst_89 : f32 to vector<8x1xf32>
    %195 = arith.divf %193, %194 : vector<8x1xf32>
    %196 = vector.broadcast %195 : vector<8x1xf32> to vector<8x32xf32>
    %197 = arith.subf %187, %196 : vector<8x32xf32>
    %198 = arith.mulf %197, %197 : vector<8x32xf32>
    %cst_90 = arith.constant dense<0.000000e+00> : vector<8xf32>
    %199 = vector.multi_reduction <add>, %198, %cst_90 [1] : vector<8x32xf32> to vector<8xf32>
    %200 = vector.shape_cast %199 : vector<8xf32> to vector<8x1xf32>
    %cst_91 = arith.constant 3.200000e+01 : f32
    %201 = vector.broadcast %cst_91 : f32 to vector<8x1xf32>
    %202 = arith.divf %200, %201 : vector<8x1xf32>
    %203 = vector.broadcast %195 : vector<8x1xf32> to vector<8x32xf32>
    %204 = arith.subf %187, %203 : vector<8x32xf32>
    %cst_92 = arith.constant 9.99999996E-13 : f32
    %205 = vector.broadcast %cst_92 : f32 to vector<8x1xf32>
    %206 = arith.addf %202, %205 : vector<8x1xf32>
    %207 = math.rsqrt %206 : vector<8x1xf32>
    %208 = vector.broadcast %207 : vector<8x1xf32> to vector<8x32xf32>
    %209 = arith.mulf %204, %208 : vector<8x32xf32>
    %210 = vector.broadcast %189 : vector<1x32xf32> to vector<8x32xf32>
    %211 = arith.mulf %209, %210 : vector<8x32xf32>
    %212 = vector.broadcast %191 : vector<1x32xf32> to vector<8x32xf32>
    %213 = arith.addf %211, %212 : vector<8x32xf32>
    %c1 = arith.constant 1 : index
    %c0_93 = arith.constant 0 : index
    %c0_94 = arith.constant 0 : index
    %214 = vector.load %arg6[%c1, %c0_93, %c0_94] : memref<2x32x96xf32, #tpu.memory_space<vmem>>, vector<1x32x96xf32>
    %215 = vector.shape_cast %214 : vector<1x32x96xf32> to vector<32x96xf32>
    %cst_95 = arith.constant dense<0.000000e+00> : vector<8x96xf32>
    %216 = tpu.matmul %213, %215, %cst_95 {dimension_numbers = #tpu.dot_dimension_numbers<[1], [0], [0], [1], [0, 0, 1, 1], [], []>} : vector<8x32xf32>, vector<32x96xf32>, vector<8x96xf32> -> vector<8x96xf32>
    %c1_96 = arith.constant 1 : index
    %c0_97 = arith.constant 0 : index
    %c0_98 = arith.constant 0 : index
    %217 = vector.load %arg7[%c1_96, %c0_97, %c0_98] : memref<2x1x96xf32, #tpu.memory_space<vmem>>, vector<1x1x96xf32>
    %218 = vector.shape_cast %217 : vector<1x1x96xf32> to vector<1x96xf32>
    %219 = vector.broadcast %218 : vector<1x96xf32> to vector<8x96xf32>
    %220 = arith.addf %216, %219 : vector<8x96xf32>
    %c1_99 = arith.constant 1 : index
    %c0_100 = arith.constant 0 : index
    %c0_101 = arith.constant 0 : index
    %221 = vector.load %arg8[%c1_99, %c0_100, %c0_101] : memref<2x32x32xf32, #tpu.memory_space<vmem>>, vector<1x32x32xf32>
    %222 = vector.shape_cast %221 : vector<1x32x32xf32> to vector<32x32xf32>
    %cst_102 = arith.constant 0.000000e+00 : f32
    %223 = vector.broadcast %cst_102 : f32 to vector<8x32xf32>
    %224 = vector.extract_strided_slice %220 {offsets = [0, 0], sizes = [8, 8], strides = [1, 1]} : vector<8x96xf32> to vector<8x8xf32>
    %225 = vector.extract_strided_slice %220 {offsets = [0, 32], sizes = [8, 8], strides = [1, 1]} : vector<8x96xf32> to vector<8x8xf32>
    %226 = vector.extract_strided_slice %220 {offsets = [0, 64], sizes = [8, 8], strides = [1, 1]} : vector<8x96xf32> to vector<8x8xf32>
    %227 = tpu.transpose %225, [1, 0] : vector<8x8xf32> -> vector<8x8xf32>
    %cst_103 = arith.constant dense<0.000000e+00> : vector<8x8xf32>
    %228 = tpu.matmul %224, %227, %cst_103 {dimension_numbers = #tpu.dot_dimension_numbers<[1], [0], [0], [1], [0, 0, 1, 1], [], []>} : vector<8x8xf32>, vector<8x8xf32>, vector<8x8xf32> -> vector<8x8xf32>
    %cst_104 = arith.constant 0.353553385 : f32
    %229 = vector.broadcast %cst_104 : f32 to vector<8x8xf32>
    %230 = arith.mulf %228, %229 : vector<8x8xf32>
    %cst_105 = arith.constant dense<0xFF800000> : vector<8xf32>
    %231 = vector.multi_reduction <maximumf>, %230, %cst_105 [1] : vector<8x8xf32> to vector<8xf32>
    %232 = vector.shape_cast %231 : vector<8xf32> to vector<8x1xf32>
    %233 = vector.broadcast %232 : vector<8x1xf32> to vector<8x8xf32>
    %234 = arith.subf %230, %233 : vector<8x8xf32>
    %235 = math.exp %234 : vector<8x8xf32>
    %cst_106 = arith.constant dense<0.000000e+00> : vector<8xf32>
    %236 = vector.multi_reduction <add>, %235, %cst_106 [1] : vector<8x8xf32> to vector<8xf32>
    %237 = vector.shape_cast %236 : vector<8xf32> to vector<8x1xf32>
    %238 = tpu.reciprocal %237 {approx = true} : vector<8x1xf32> -> vector<8x1xf32>
    %239 = vector.broadcast %238 : vector<8x1xf32> to vector<8x8xf32>
    %240 = arith.mulf %235, %239 : vector<8x8xf32>
    %cst_107 = arith.constant dense<0.000000e+00> : vector<8x8xf32>
    %241 = tpu.matmul %240, %226, %cst_107 {dimension_numbers = #tpu.dot_dimension_numbers<[1], [0], [0], [1], [0, 0, 1, 1], [], []>} : vector<8x8xf32>, vector<8x8xf32>, vector<8x8xf32> -> vector<8x8xf32>
    %242 = vector.extract_strided_slice %222 {offsets = [0, 0], sizes = [8, 32], strides = [1, 1]} : vector<32x32xf32> to vector<8x32xf32>
    %cst_108 = arith.constant dense<0.000000e+00> : vector<8x32xf32>
    %243 = tpu.matmul %241, %242, %cst_108 {dimension_numbers = #tpu.dot_dimension_numbers<[1], [0], [0], [1], [0, 0, 1, 1], [], []>} : vector<8x8xf32>, vector<8x32xf32>, vector<8x32xf32> -> vector<8x32xf32>
    %244 = arith.addf %223, %243 : vector<8x32xf32>
    %245 = vector.extract_strided_slice %220 {offsets = [0, 8], sizes = [8, 8], strides = [1, 1]} : vector<8x96xf32> to vector<8x8xf32>
    %246 = vector.extract_strided_slice %220 {offsets = [0, 40], sizes = [8, 8], strides = [1, 1]} : vector<8x96xf32> to vector<8x8xf32>
    %247 = vector.extract_strided_slice %220 {offsets = [0, 72], sizes = [8, 8], strides = [1, 1]} : vector<8x96xf32> to vector<8x8xf32>
    %248 = tpu.transpose %246, [1, 0] : vector<8x8xf32> -> vector<8x8xf32>
    %cst_109 = arith.constant dense<0.000000e+00> : vector<8x8xf32>
    %249 = tpu.matmul %245, %248, %cst_109 {dimension_numbers = #tpu.dot_dimension_numbers<[1], [0], [0], [1], [0, 0, 1, 1], [], []>} : vector<8x8xf32>, vector<8x8xf32>, vector<8x8xf32> -> vector<8x8xf32>
    %cst_110 = arith.constant 0.353553385 : f32
    %250 = vector.broadcast %cst_110 : f32 to vector<8x8xf32>
    %251 = arith.mulf %249, %250 : vector<8x8xf32>
    %cst_111 = arith.constant dense<0xFF800000> : vector<8xf32>
    %252 = vector.multi_reduction <maximumf>, %251, %cst_111 [1] : vector<8x8xf32> to vector<8xf32>
    %253 = vector.shape_cast %252 : vector<8xf32> to vector<8x1xf32>
    %254 = vector.broadcast %253 : vector<8x1xf32> to vector<8x8xf32>
    %255 = arith.subf %251, %254 : vector<8x8xf32>
    %256 = math.exp %255 : vector<8x8xf32>
    %cst_112 = arith.constant dense<0.000000e+00> : vector<8xf32>
    %257 = vector.multi_reduction <add>, %256, %cst_112 [1] : vector<8x8xf32> to vector<8xf32>
    %258 = vector.shape_cast %257 : vector<8xf32> to vector<8x1xf32>
    %259 = tpu.reciprocal %258 {approx = true} : vector<8x1xf32> -> vector<8x1xf32>
    %260 = vector.broadcast %259 : vector<8x1xf32> to vector<8x8xf32>
    %261 = arith.mulf %256, %260 : vector<8x8xf32>
    %cst_113 = arith.constant dense<0.000000e+00> : vector<8x8xf32>
    %262 = tpu.matmul %261, %247, %cst_113 {dimension_numbers = #tpu.dot_dimension_numbers<[1], [0], [0], [1], [0, 0, 1, 1], [], []>} : vector<8x8xf32>, vector<8x8xf32>, vector<8x8xf32> -> vector<8x8xf32>
    %263 = vector.extract_strided_slice %222 {offsets = [8, 0], sizes = [8, 32], strides = [1, 1]} : vector<32x32xf32> to vector<8x32xf32>
    %cst_114 = arith.constant dense<0.000000e+00> : vector<8x32xf32>
    %264 = tpu.matmul %262, %263, %cst_114 {dimension_numbers = #tpu.dot_dimension_numbers<[1], [0], [0], [1], [0, 0, 1, 1], [], []>} : vector<8x8xf32>, vector<8x32xf32>, vector<8x32xf32> -> vector<8x32xf32>
    %265 = arith.addf %244, %264 : vector<8x32xf32>
    %266 = vector.extract_strided_slice %220 {offsets = [0, 16], sizes = [8, 8], strides = [1, 1]} : vector<8x96xf32> to vector<8x8xf32>
    %267 = vector.extract_strided_slice %220 {offsets = [0, 48], sizes = [8, 8], strides = [1, 1]} : vector<8x96xf32> to vector<8x8xf32>
    %268 = vector.extract_strided_slice %220 {offsets = [0, 80], sizes = [8, 8], strides = [1, 1]} : vector<8x96xf32> to vector<8x8xf32>
    %269 = tpu.transpose %267, [1, 0] : vector<8x8xf32> -> vector<8x8xf32>
    %cst_115 = arith.constant dense<0.000000e+00> : vector<8x8xf32>
    %270 = tpu.matmul %266, %269, %cst_115 {dimension_numbers = #tpu.dot_dimension_numbers<[1], [0], [0], [1], [0, 0, 1, 1], [], []>} : vector<8x8xf32>, vector<8x8xf32>, vector<8x8xf32> -> vector<8x8xf32>
    %cst_116 = arith.constant 0.353553385 : f32
    %271 = vector.broadcast %cst_116 : f32 to vector<8x8xf32>
    %272 = arith.mulf %270, %271 : vector<8x8xf32>
    %cst_117 = arith.constant dense<0xFF800000> : vector<8xf32>
    %273 = vector.multi_reduction <maximumf>, %272, %cst_117 [1] : vector<8x8xf32> to vector<8xf32>
    %274 = vector.shape_cast %273 : vector<8xf32> to vector<8x1xf32>
    %275 = vector.broadcast %274 : vector<8x1xf32> to vector<8x8xf32>
    %276 = arith.subf %272, %275 : vector<8x8xf32>
    %277 = math.exp %276 : vector<8x8xf32>
    %cst_118 = arith.constant dense<0.000000e+00> : vector<8xf32>
    %278 = vector.multi_reduction <add>, %277, %cst_118 [1] : vector<8x8xf32> to vector<8xf32>
    %279 = vector.shape_cast %278 : vector<8xf32> to vector<8x1xf32>
    %280 = tpu.reciprocal %279 {approx = true} : vector<8x1xf32> -> vector<8x1xf32>
    %281 = vector.broadcast %280 : vector<8x1xf32> to vector<8x8xf32>
    %282 = arith.mulf %277, %281 : vector<8x8xf32>
    %cst_119 = arith.constant dense<0.000000e+00> : vector<8x8xf32>
    %283 = tpu.matmul %282, %268, %cst_119 {dimension_numbers = #tpu.dot_dimension_numbers<[1], [0], [0], [1], [0, 0, 1, 1], [], []>} : vector<8x8xf32>, vector<8x8xf32>, vector<8x8xf32> -> vector<8x8xf32>
    %284 = vector.extract_strided_slice %222 {offsets = [16, 0], sizes = [8, 32], strides = [1, 1]} : vector<32x32xf32> to vector<8x32xf32>
    %cst_120 = arith.constant dense<0.000000e+00> : vector<8x32xf32>
    %285 = tpu.matmul %283, %284, %cst_120 {dimension_numbers = #tpu.dot_dimension_numbers<[1], [0], [0], [1], [0, 0, 1, 1], [], []>} : vector<8x8xf32>, vector<8x32xf32>, vector<8x32xf32> -> vector<8x32xf32>
    %286 = arith.addf %265, %285 : vector<8x32xf32>
    %287 = vector.extract_strided_slice %220 {offsets = [0, 24], sizes = [8, 8], strides = [1, 1]} : vector<8x96xf32> to vector<8x8xf32>
    %288 = vector.extract_strided_slice %220 {offsets = [0, 56], sizes = [8, 8], strides = [1, 1]} : vector<8x96xf32> to vector<8x8xf32>
    %289 = vector.extract_strided_slice %220 {offsets = [0, 88], sizes = [8, 8], strides = [1, 1]} : vector<8x96xf32> to vector<8x8xf32>
    %290 = tpu.transpose %288, [1, 0] : vector<8x8xf32> -> vector<8x8xf32>
    %cst_121 = arith.constant dense<0.000000e+00> : vector<8x8xf32>
    %291 = tpu.matmul %287, %290, %cst_121 {dimension_numbers = #tpu.dot_dimension_numbers<[1], [0], [0], [1], [0, 0, 1, 1], [], []>} : vector<8x8xf32>, vector<8x8xf32>, vector<8x8xf32> -> vector<8x8xf32>
    %cst_122 = arith.constant 0.353553385 : f32
    %292 = vector.broadcast %cst_122 : f32 to vector<8x8xf32>
    %293 = arith.mulf %291, %292 : vector<8x8xf32>
    %cst_123 = arith.constant dense<0xFF800000> : vector<8xf32>
    %294 = vector.multi_reduction <maximumf>, %293, %cst_123 [1] : vector<8x8xf32> to vector<8xf32>
    %295 = vector.shape_cast %294 : vector<8xf32> to vector<8x1xf32>
    %296 = vector.broadcast %295 : vector<8x1xf32> to vector<8x8xf32>
    %297 = arith.subf %293, %296 : vector<8x8xf32>
    %298 = math.exp %297 : vector<8x8xf32>
    %cst_124 = arith.constant dense<0.000000e+00> : vector<8xf32>
    %299 = vector.multi_reduction <add>, %298, %cst_124 [1] : vector<8x8xf32> to vector<8xf32>
    %300 = vector.shape_cast %299 : vector<8xf32> to vector<8x1xf32>
    %301 = tpu.reciprocal %300 {approx = true} : vector<8x1xf32> -> vector<8x1xf32>
    %302 = vector.broadcast %301 : vector<8x1xf32> to vector<8x8xf32>
    %303 = arith.mulf %298, %302 : vector<8x8xf32>
    %cst_125 = arith.constant dense<0.000000e+00> : vector<8x8xf32>
    %304 = tpu.matmul %303, %289, %cst_125 {dimension_numbers = #tpu.dot_dimension_numbers<[1], [0], [0], [1], [0, 0, 1, 1], [], []>} : vector<8x8xf32>, vector<8x8xf32>, vector<8x8xf32> -> vector<8x8xf32>
    %305 = vector.extract_strided_slice %222 {offsets = [24, 0], sizes = [8, 32], strides = [1, 1]} : vector<32x32xf32> to vector<8x32xf32>
    %cst_126 = arith.constant dense<0.000000e+00> : vector<8x32xf32>
    %306 = tpu.matmul %304, %305, %cst_126 {dimension_numbers = #tpu.dot_dimension_numbers<[1], [0], [0], [1], [0, 0, 1, 1], [], []>} : vector<8x8xf32>, vector<8x32xf32>, vector<8x32xf32> -> vector<8x32xf32>
    %307 = arith.addf %286, %306 : vector<8x32xf32>
    %c1_127 = arith.constant 1 : index
    %c0_128 = arith.constant 0 : index
    %c0_129 = arith.constant 0 : index
    %308 = vector.load %arg9[%c1_127, %c0_128, %c0_129] : memref<2x1x32xf32, #tpu.memory_space<vmem>>, vector<1x1x32xf32>
    %309 = vector.shape_cast %308 : vector<1x1x32xf32> to vector<1x32xf32>
    %310 = vector.broadcast %309 : vector<1x32xf32> to vector<8x32xf32>
    %311 = arith.addf %307, %310 : vector<8x32xf32>
    %312 = arith.addf %213, %311 : vector<8x32xf32>
    %c1_130 = arith.constant 1 : index
    %c0_131 = arith.constant 0 : index
    %c0_132 = arith.constant 0 : index
    %313 = vector.load %arg10[%c1_130, %c0_131, %c0_132] : memref<2x1x32xf32, #tpu.memory_space<vmem>>, vector<1x1x32xf32>
    %314 = vector.shape_cast %313 : vector<1x1x32xf32> to vector<1x32xf32>
    %c1_133 = arith.constant 1 : index
    %c0_134 = arith.constant 0 : index
    %c0_135 = arith.constant 0 : index
    %315 = vector.load %arg11[%c1_133, %c0_134, %c0_135] : memref<2x1x32xf32, #tpu.memory_space<vmem>>, vector<1x1x32xf32>
    %316 = vector.shape_cast %315 : vector<1x1x32xf32> to vector<1x32xf32>
    %cst_136 = arith.constant dense<0.000000e+00> : vector<8xf32>
    %317 = vector.multi_reduction <add>, %312, %cst_136 [1] : vector<8x32xf32> to vector<8xf32>
    %318 = vector.shape_cast %317 : vector<8xf32> to vector<8x1xf32>
    %cst_137 = arith.constant 3.200000e+01 : f32
    %319 = vector.broadcast %cst_137 : f32 to vector<8x1xf32>
    %320 = arith.divf %318, %319 : vector<8x1xf32>
    %321 = vector.broadcast %320 : vector<8x1xf32> to vector<8x32xf32>
    %322 = arith.subf %312, %321 : vector<8x32xf32>
    %323 = arith.mulf %322, %322 : vector<8x32xf32>
    %cst_138 = arith.constant dense<0.000000e+00> : vector<8xf32>
    %324 = vector.multi_reduction <add>, %323, %cst_138 [1] : vector<8x32xf32> to vector<8xf32>
    %325 = vector.shape_cast %324 : vector<8xf32> to vector<8x1xf32>
    %cst_139 = arith.constant 3.200000e+01 : f32
    %326 = vector.broadcast %cst_139 : f32 to vector<8x1xf32>
    %327 = arith.divf %325, %326 : vector<8x1xf32>
    %328 = vector.broadcast %320 : vector<8x1xf32> to vector<8x32xf32>
    %329 = arith.subf %312, %328 : vector<8x32xf32>
    %cst_140 = arith.constant 9.99999996E-13 : f32
    %330 = vector.broadcast %cst_140 : f32 to vector<8x1xf32>
    %331 = arith.addf %327, %330 : vector<8x1xf32>
    %332 = math.rsqrt %331 : vector<8x1xf32>
    %333 = vector.broadcast %332 : vector<8x1xf32> to vector<8x32xf32>
    %334 = arith.mulf %329, %333 : vector<8x32xf32>
    %335 = vector.broadcast %314 : vector<1x32xf32> to vector<8x32xf32>
    %336 = arith.mulf %334, %335 : vector<8x32xf32>
    %337 = vector.broadcast %316 : vector<1x32xf32> to vector<8x32xf32>
    %338 = arith.addf %336, %337 : vector<8x32xf32>
    %c1_141 = arith.constant 1 : index
    %c0_142 = arith.constant 0 : index
    %c0_143 = arith.constant 0 : index
    %339 = vector.load %arg12[%c1_141, %c0_142, %c0_143] : memref<2x32x64xf32, #tpu.memory_space<vmem>>, vector<1x32x64xf32>
    %340 = vector.shape_cast %339 : vector<1x32x64xf32> to vector<32x64xf32>
    %cst_144 = arith.constant dense<0.000000e+00> : vector<8x64xf32>
    %341 = tpu.matmul %338, %340, %cst_144 {dimension_numbers = #tpu.dot_dimension_numbers<[1], [0], [0], [1], [0, 0, 1, 1], [], []>} : vector<8x32xf32>, vector<32x64xf32>, vector<8x64xf32> -> vector<8x64xf32>
    %c1_145 = arith.constant 1 : index
    %c0_146 = arith.constant 0 : index
    %c0_147 = arith.constant 0 : index
    %342 = vector.load %arg13[%c1_145, %c0_146, %c0_147] : memref<2x1x64xf32, #tpu.memory_space<vmem>>, vector<1x1x64xf32>
    %343 = vector.shape_cast %342 : vector<1x1x64xf32> to vector<1x64xf32>
    %344 = vector.broadcast %343 : vector<1x64xf32> to vector<8x64xf32>
    %345 = arith.addf %341, %344 : vector<8x64xf32>
    %cst_148 = arith.constant 5.000000e-01 : f32
    %346 = vector.broadcast %cst_148 : f32 to vector<8x64xf32>
    %347 = arith.mulf %346, %345 : vector<8x64xf32>
    %cst_149 = arith.constant 4.471500e-02 : f32
    %348 = vector.broadcast %cst_149 : f32 to vector<8x64xf32>
    %349 = arith.mulf %348, %345 : vector<8x64xf32>
    %350 = arith.mulf %349, %345 : vector<8x64xf32>
    %351 = arith.mulf %350, %345 : vector<8x64xf32>
    %352 = arith.addf %345, %351 : vector<8x64xf32>
    %cst_150 = arith.constant 0.797884583 : f32
    %353 = vector.broadcast %cst_150 : f32 to vector<8x64xf32>
    %354 = arith.mulf %353, %352 : vector<8x64xf32>
    %355 = math.tanh %354 : vector<8x64xf32>
    %cst_151 = arith.constant 1.000000e+00 : f32
    %356 = vector.broadcast %cst_151 : f32 to vector<8x64xf32>
    %357 = arith.addf %356, %355 : vector<8x64xf32>
    %358 = arith.mulf %347, %357 : vector<8x64xf32>
    %c1_152 = arith.constant 1 : index
    %c0_153 = arith.constant 0 : index
    %c0_154 = arith.constant 0 : index
    %359 = vector.load %arg14[%c1_152, %c0_153, %c0_154] : memref<2x64x32xf32, #tpu.memory_space<vmem>>, vector<1x64x32xf32>
    %360 = vector.shape_cast %359 : vector<1x64x32xf32> to vector<64x32xf32>
    %cst_155 = arith.constant dense<0.000000e+00> : vector<8x32xf32>
    %361 = tpu.matmul %358, %360, %cst_155 {dimension_numbers = #tpu.dot_dimension_numbers<[1], [0], [0], [1], [0, 0, 1, 1], [], []>} : vector<8x64xf32>, vector<64x32xf32>, vector<8x32xf32> -> vector<8x32xf32>
    %c1_156 = arith.constant 1 : index
    %c0_157 = arith.constant 0 : index
    %c0_158 = arith.constant 0 : index
    %362 = vector.load %arg15[%c1_156, %c0_157, %c0_158] : memref<2x1x32xf32, #tpu.memory_space<vmem>>, vector<1x1x32xf32>
    %363 = vector.shape_cast %362 : vector<1x1x32xf32> to vector<1x32xf32>
    %364 = vector.broadcast %363 : vector<1x32xf32> to vector<8x32xf32>
    %365 = arith.addf %361, %364 : vector<8x32xf32>
    %366 = arith.addf %338, %365 : vector<8x32xf32>
    %c1_159 = arith.constant 1 : index
    %c0_160 = arith.constant 0 : index
    %c0_161 = arith.constant 0 : index
    %367 = vector.load %arg16[%c1_159, %c0_160, %c0_161] : memref<2x1x32xf32, #tpu.memory_space<vmem>>, vector<1x1x32xf32>
    %368 = vector.shape_cast %367 : vector<1x1x32xf32> to vector<1x32xf32>
    %c1_162 = arith.constant 1 : index
    %c0_163 = arith.constant 0 : index
    %c0_164 = arith.constant 0 : index
    %369 = vector.load %arg17[%c1_162, %c0_163, %c0_164] : memref<2x1x32xf32, #tpu.memory_space<vmem>>, vector<1x1x32xf32>
    %370 = vector.shape_cast %369 : vector<1x1x32xf32> to vector<1x32xf32>
    %cst_165 = arith.constant dense<0.000000e+00> : vector<8xf32>
    %371 = vector.multi_reduction <add>, %366, %cst_165 [1] : vector<8x32xf32> to vector<8xf32>
    %372 = vector.shape_cast %371 : vector<8xf32> to vector<8x1xf32>
    %cst_166 = arith.constant 3.200000e+01 : f32
    %373 = vector.broadcast %cst_166 : f32 to vector<8x1xf32>
    %374 = arith.divf %372, %373 : vector<8x1xf32>
    %375 = vector.broadcast %374 : vector<8x1xf32> to vector<8x32xf32>
    %376 = arith.subf %366, %375 : vector<8x32xf32>
    %377 = arith.mulf %376, %376 : vector<8x32xf32>
    %cst_167 = arith.constant dense<0.000000e+00> : vector<8xf32>
    %378 = vector.multi_reduction <add>, %377, %cst_167 [1] : vector<8x32xf32> to vector<8xf32>
    %379 = vector.shape_cast %378 : vector<8xf32> to vector<8x1xf32>
    %cst_168 = arith.constant 3.200000e+01 : f32
    %380 = vector.broadcast %cst_168 : f32 to vector<8x1xf32>
    %381 = arith.divf %379, %380 : vector<8x1xf32>
    %382 = vector.broadcast %374 : vector<8x1xf32> to vector<8x32xf32>
    %383 = arith.subf %366, %382 : vector<8x32xf32>
    %cst_169 = arith.constant 9.99999996E-13 : f32
    %384 = vector.broadcast %cst_169 : f32 to vector<8x1xf32>
    %385 = arith.addf %381, %384 : vector<8x1xf32>
    %386 = math.rsqrt %385 : vector<8x1xf32>
    %387 = vector.broadcast %386 : vector<8x1xf32> to vector<8x32xf32>
    %388 = arith.mulf %383, %387 : vector<8x32xf32>
    %389 = vector.broadcast %368 : vector<1x32xf32> to vector<8x32xf32>
    %390 = arith.mulf %388, %389 : vector<8x32xf32>
    %391 = vector.broadcast %370 : vector<1x32xf32> to vector<8x32xf32>
    %392 = arith.addf %390, %391 : vector<8x32xf32>
    %393 = vector.extract_strided_slice %392 {offsets = [0, 0], sizes = [1, 32], strides = [1, 1]} : vector<8x32xf32> to vector<1x32xf32>
    %c0_170 = arith.constant 0 : index
    %c0_171 = arith.constant 0 : index
    %394 = vector.load %arg18[%c0_170, %c0_171] : memref<32x256xf32, #tpu.memory_space<vmem>>, vector<32x256xf32>
    %cst_172 = arith.constant dense<0.000000e+00> : vector<1x256xf32>
    %395 = tpu.matmul %393, %394, %cst_172 {dimension_numbers = #tpu.dot_dimension_numbers<[1], [0], [0], [1], [0, 0, 1, 1], [], []>} : vector<1x32xf32>, vector<32x256xf32>, vector<1x256xf32> -> vector<1x256xf32>
    %c0_173 = arith.constant 0 : index
    %c0_174 = arith.constant 0 : index
    %396 = vector.load %arg19[%c0_173, %c0_174] : memref<1x256xf32, #tpu.memory_space<vmem>>, vector<1x256xf32>
    %397 = arith.addf %395, %396 : vector<1x256xf32>
    %c0_175 = arith.constant 0 : index
    %c0_176 = arith.constant 0 : index
    %c0_177 = arith.constant 0 : index
    %398 = vector.load %arg20[%c0_175, %c0_176, %c0_177] : memref<1x1x256xf32, #tpu.memory_space<vmem>>, vector<1x1x256xf32>
    %399 = vector.shape_cast %398 : vector<1x1x256xf32> to vector<1x256xf32>
    %400 = vector.shape_cast %397 : vector<1x256xf32> to vector<1x1x256xf32>
    tpu.vector_store %arg20[%c0_175, %c0_176, %c0_177], %400 {strides = array<i32>} : memref<1x1x256xf32, #tpu.memory_space<vmem>>, vector<1x1x256xf32>,
    return
  }
  func.func @transform_0(%arg0: i32) -> (i32, i32, i32) {
    %c0_i32 = arith.constant 0 : i32
    %c0_i32_0 = arith.constant 0 : i32
    %c0_i32_1 = arith.constant 0 : i32
    return %arg0, %c0_i32, %c0_i32_0 : i32, i32, i32
  }
  func.func @transform_1(%arg0: i32) -> (i32, i32) {
    %c0_i32 = arith.constant 0 : i32
    %c0_i32_0 = arith.constant 0 : i32
    %c0_i32_1 = arith.constant 0 : i32
    return %c0_i32, %c0_i32_0 : i32, i32
  }
  func.func @transform_2(%arg0: i32) -> (i32, i32) {
    %c0_i32 = arith.constant 0 : i32
    %c0_i32_0 = arith.constant 0 : i32
    %c0_i32_1 = arith.constant 0 : i32
    return %c0_i32, %c0_i32_0 : i32, i32
  }
  func.func @transform_3(%arg0: i32) -> (i32, i32) {
    %c0_i32 = arith.constant 0 : i32
    %c0_i32_0 = arith.constant 0 : i32
    %c0_i32_1 = arith.constant 0 : i32
    return %c0_i32, %c0_i32_0 : i32, i32
  }
  func.func @transform_4(%arg0: i32) -> (i32, i32) {
    %c0_i32 = arith.constant 0 : i32
    %c0_i32_0 = arith.constant 0 : i32
    %c0_i32_1 = arith.constant 0 : i32
    return %c0_i32, %c0_i32_0 : i32, i32
  }
  func.func @transform_5(%arg0: i32) -> (i32, i32, i32) {
    %c0_i32 = arith.constant 0 : i32
    %c0_i32_0 = arith.constant 0 : i32
    %c0_i32_1 = arith.constant 0 : i32
    %c0_i32_2 = arith.constant 0 : i32
    return %c0_i32, %c0_i32_0, %c0_i32_1 : i32, i32, i32
  }
  func.func @transform_6(%arg0: i32) -> (i32, i32, i32) {
    %c0_i32 = arith.constant 0 : i32
    %c0_i32_0 = arith.constant 0 : i32
    %c0_i32_1 = arith.constant 0 : i32
    %c0_i32_2 = arith.constant 0 : i32
    return %c0_i32, %c0_i32_0, %c0_i32_1 : i32, i32, i32
  }
  func.func @transform_7(%arg0: i32) -> (i32, i32, i32) {
    %c0_i32 = arith.constant 0 : i32
    %c0_i32_0 = arith.constant 0 : i32
    %c0_i32_1 = arith.constant 0 : i32
    %c0_i32_2 = arith.constant 0 : i32
    return %c0_i32, %c0_i32_0, %c0_i32_1 : i32, i32, i32
  }
  func.func @transform_8(%arg0: i32) -> (i32, i32, i32) {
    %c0_i32 = arith.constant 0 : i32
    %c0_i32_0 = arith.constant 0 : i32
    %c0_i32_1 = arith.constant 0 : i32
    %c0_i32_2 = arith.constant 0 : i32
    return %c0_i32, %c0_i32_0, %c0_i32_1 : i32, i32, i32
  }
  func.func @transform_9(%arg0: i32) -> (i32, i32, i32) {
    %c0_i32 = arith.constant 0 : i32
    %c0_i32_0 = arith.constant 0 : i32
    %c0_i32_1 = arith.constant 0 : i32
    %c0_i32_2 = arith.constant 0 : i32
    return %c0_i32, %c0_i32_0, %c0_i32_1 : i32, i32, i32
  }
  func.func @transform_10(%arg0: i32) -> (i32, i32, i32) {
    %c0_i32 = arith.constant 0 : i32
    %c0_i32_0 = arith.constant 0 : i32
    %c0_i32_1 = arith.constant 0 : i32
    %c0_i32_2 = arith.constant 0 : i32
    return %c0_i32, %c0_i32_0, %c0_i32_1 : i32, i32, i32
  }
  func.func @transform_11(%arg0: i32) -> (i32, i32, i32) {
    %c0_i32 = arith.constant 0 : i32
    %c0_i32_0 = arith.constant 0 : i32
    %c0_i32_1 = arith.constant 0 : i32
    %c0_i32_2 = arith.constant 0 : i32
    return %c0_i32, %c0_i32_0, %c0_i32_1 : i32, i32, i32
  }
  func.func @transform_12(%arg0: i32) -> (i32, i32, i32) {
    %c0_i32 = arith.constant 0 : i32
    %c0_i32_0 = arith.constant 0 : i32
    %c0_i32_1 = arith.constant 0 : i32
    %c0_i32_2 = arith.constant 0 : i32
    return %c0_i32, %c0_i32_0, %c0_i32_1 : i32, i32, i32
  }
  func.func @transform_13(%arg0: i32) -> (i32, i32, i32) {
    %c0_i32 = arith.constant 0 : i32
    %c0_i32_0 = arith.constant 0 : i32
    %c0_i32_1 = arith.constant 0 : i32
    %c0_i32_2 = arith.constant 0 : i32
    return %c0_i32, %c0_i32_0, %c0_i32_1 : i32, i32, i32
  }
  func.func @transform_14(%arg0: i32) -> (i32, i32, i32) {
    %c0_i32 = arith.constant 0 : i32
    %c0_i32_0 = arith.constant 0 : i32
    %c0_i32_1 = arith.constant 0 : i32
    %c0_i32_2 = arith.constant 0 : i32
    return %c0_i32, %c0_i32_0, %c0_i32_1 : i32, i32, i32
  }
  func.func @transform_15(%arg0: i32) -> (i32, i32, i32) {
    %c0_i32 = arith.constant 0 : i32
    %c0_i32_0 = arith.constant 0 : i32
    %c0_i32_1 = arith.constant 0 : i32
    %c0_i32_2 = arith.constant 0 : i32
    return %c0_i32, %c0_i32_0, %c0_i32_1 : i32, i32, i32
  }
  func.func @transform_16(%arg0: i32) -> (i32, i32, i32) {
    %c0_i32 = arith.constant 0 : i32
    %c0_i32_0 = arith.constant 0 : i32
    %c0_i32_1 = arith.constant 0 : i32
    %c0_i32_2 = arith.constant 0 : i32
    return %c0_i32, %c0_i32_0, %c0_i32_1 : i32, i32, i32
  }
  func.func @transform_17(%arg0: i32) -> (i32, i32) {
    %c0_i32 = arith.constant 0 : i32
    %c0_i32_0 = arith.constant 0 : i32
    %c0_i32_1 = arith.constant 0 : i32
    return %c0_i32, %c0_i32_0 : i32, i32
  }
  func.func @transform_18(%arg0: i32) -> (i32, i32) {
    %c0_i32 = arith.constant 0 : i32
    %c0_i32_0 = arith.constant 0 : i32
    %c0_i32_1 = arith.constant 0 : i32
    return %c0_i32, %c0_i32_0 : i32, i32
  }
  func.func @transform_19(%arg0: i32) -> (i32, i32, i32) {
    %c0_i32 = arith.constant 0 : i32
    %c0_i32_0 = arith.constant 0 : i32
    %c0_i32_1 = arith.constant 0 : i32
    return %arg0, %c0_i32, %c0_i32_0 : i32, i32, i32
  }
}

</mosaic_0001>

<bundles_post_ra>
// kernel: pn_model_forward.1
= control target key start
LH: loop header
LB: loop body
LE: loop exit
PB: predicated region body
PF: predicated region fallthrough
CT: control target
= control target key end

     0   :  { %s4720_s0 = inlined_call_operand.vmem [shape: s32[2,8,1], index: 0, kind: input, shape index: {}]   ;;  %s4721_s1 = inlined_call_operand.vmem [shape: f32[128,32], index: 1, kind: input, shape index: {}]   ;;  %s4722_s2 = inlined_call_operand.vmem [shape: f32[8,32], index: 2, kind: input, shape index: {}]   ;;  %s4723_s3 = inlined_call_operand.vmem [shape: f32[1,32], index: 3, kind: input, shape index: {}]   ;;  %s4724_s4 = inlined_call_operand.vmem [shape: f32[1,32], index: 4, kind: input, shape index: {}]   ;;  %s4725_s5 = inlined_call_operand.vmem [shape: f32[2,32,96], index: 5, kind: input, shape index: {}]   ;;  %s4726_s6 = inlined_call_operand.vmem [shape: f32[2,1,96], index: 6, kind: input, shape index: {}]   ;;  %s4727_s7 = inlined_call_operand.vmem [shape: f32[2,32,32], index: 7, kind: input, shape index: {}]   ;;  %s4728_s8 = inlined_call_operand.vmem [shape: f32[2,1,32], index: 8, kind: input, shape index: {}]   ;;  %s4729_s9 = inlined_call_operand.vmem [shape: f32[2,1,32], index: 9, kind: input, shape index: {}]   ;;  %s4730_s10 = inlined_call_operand.vmem [shape: f32[2,1,32], index: 10, kind: input, shape index: {}]   ;;  %s4731_s11 = inlined_call_operand.vmem [shape: f32[2,32,64], index: 11, kind: input, shape index: {}]   ;;  %s4732_s12 = inlined_call_operand.vmem [shape: f32[2,1,64], index: 12, kind: input, shape index: {}]   ;;  %s4733_s13 = inlined_call_operand.vmem [shape: f32[2,64,32], index: 13, kind: input, shape index: {}]   ;;  %s4734_s14 = inlined_call_operand.vmem [shape: f32[2,1,32], index: 14, kind: input, shape index: {}]   ;;  %s4735_s15 = inlined_call_operand.vmem [shape: f32[2,1,32], index: 15, kind: input, shape index: {}]   ;;  %s4736_s16 = inlined_call_operand.vmem [shape: f32[2,1,32], index: 16, kind: input, shape index: {}]   ;;  %s4737_s17 = inlined_call_operand.vmem [shape: f32[32,256], index: 17, kind: input, shape index: {}]   ;;  %s4738_s18 = inlined_call_operand.vmem [shape: f32[1,256], index: 18, kind: input, shape index: {}]   ;;  %s4739_s19 = inlined_call_operand.vmem [shape: f32[2,1,256], index: 19, kind: output, shape index: {}]  }
   0x1   :  { %4749 = sst [smem:[#allocation2_spill]] %s4720_s0  ;;  %s4210_s0 = smov 0  }
   0x2   :  { %4750 = sst [smem:[#allocation3_spill]] %s4721_s1 }
   0x3   :  { %4751 = sst [smem:[#allocation4_spill]] %s4722_s2 }
   0x4   :  { %4752 = sst [smem:[#allocation5_spill]] %s4723_s3 }
   0x5 LB: > { %s3497_s30 = sadd.s32 4294967295, %s4091_s0   ;;  %p3501_p0 = scmp.ge.s32.totalorder %s4091_s0, 1  ;;  %s4091_s0 = sphi %s4210_s0, %s29_s0  }
   0x6   : > { %p536_p1 = scmp.lt.s32.totalorder %s4091_s0, 3 }
   0x8   : > { %p537_p2 = pnand %p3501_p0, %p536_p1 }
   0x9   : > { %p590_p3 = scmp.lt.s32.totalorder (!%p537_p2), %s3497_s30, 1  ;;  %s4753_s1 = sld [smem:[#allocation3_spill]] (!%p537_p2)  ;;  %v4093_v3 = vmov (!%p537_p2), 0   ;;  %v4094_v4 = vmov (!%p537_p2), 0.0|0.0   ;;  %vm4095_vm0 = vmmov (!%p537_p2), 0   ;;  %v4096_v14 = vmov (!%p537_p2), 0.0  }
   0xa   : > { %540 = sbr.rel (%p537_p2) target bundleno = 8208 (0x2010), region = 96  ;;  %4038 = vset.pattern.permute.xlu0 (!%p537_p2), %v4093_v3  ;;  %3933 = vmatprep.subr.bf16.mxu0 (!%p537_p2), %v4094_v4  ;;  %s4754_s2 = sld [smem:[#allocation2_spill]] (!%p537_p2)  ;;  %v599_v28 = vlaneseq (!%p537_p2)  ;;  %v4097_v31 = vmov (!%p537_p2), 1.0   ;;  %vm696_vm2 = vcmask (!%p537_p2), 261120   ;;  %v725_v42 = vld [vmem:[%s4725_s5] sm:$0xff] (!%p537_p2)  ;;  %v726_v43 = vld [vmem:[%s4725_s5 + $0x8] sm:$0xff] (!%p537_p2) }
   0xb   : > { %3957 = vmatprep.subr.bf16.mxu1 (!%p537_p2), %v4094_v4  ;;  %3728 = vmatprep.mubr.msk.f32.mxu0 (!%p537_p2), %vm4095_vm0, %v4096_v14  ;;  %v727_v44 = vld [vmem:[%s4725_s5 + $0x10] sm:$0xff] (!%p537_p2)  ;;  %v3958_v45 = vpack.c.bf16 (!%p537_p2), %v726_v43, %v725_v42  ;;  %v728_v46 = vld [vmem:[%s4725_s5 + $0x18] sm:$0xff] (!%p537_p2)  ;;  %s4756_s22 = sld [smem:[#allocation5_spill]] (!%p537_p2)  ;;  %v3507_v54 = vld [vmem:[%s4724_s4] ss:$0 sm:$0xff] (!%p537_p2)  ;;  %s4746_s3 = smov (!%p537_p2), 64  }
   0xc   : > { %3739 = vmatprep.mubr.msk.f32.mxu1 (!%p537_p2), %vm4095_vm0, %v4096_v14  ;;  %v600_v29 = vand.u32 (!%p537_p2), 127, %v599_v28  ;;  %v3961_v47 = vpack.c.bf16 (!%p537_p2), %v728_v46, %v727_v44  ;;  %v3508_v57 = vld [vmem:[%s4726_s6] ss:$0 sm:$0xff] (!%p537_p2)  ;;  %s4099_s27 = smov (!%p537_p2), 96   ;;  %vm816_vm3 = vcmask (!%p537_p2), 64512   ;;  %s4101_s28 = smov (!%p537_p2), 120  }
   0xd   : > { %3959 = vmatpush3.bf16.msra.mxu1 (!%p537_p2), %v3958_v45  ;;  %s4745_s29 = smov (!%p537_p2), 80   ;;  %s4747_s20 = smov (!%p537_p2), 112   ;;  %v810_v42 = vld [vmem:[%s4727_s7 + $0x8] sm:$0xff] (!%p537_p2)  ;;  %v809_v44 = vld [vmem:[%s4727_s7] sm:$0xff] (!%p537_p2)  ;;  %vm1917_vm4 = vcmask (!%p537_p2), 523264   ;;  %vm3441_vm5 = vcmp.lt.s32.totalorder (!%p537_p2), %v599_v28, 256 }
   0xe   : > { %3960 = vmatprep.subr.bf16.mxu1 (!%p537_p2), %v4094_v4  ;;  %s4748_s21 = smov (!%p537_p2), 56   ;;  %s4743_s24 = smov (!%p537_p2), 40  }
   0xf   : > { %v607_v0 = vld [vmem:[%s4753_s1] sm:$0xff] (!%p537_p2)  ;;  %v608_v1 = vld [vmem:[%s4753_s1 + $0x8] sm:$0xff] (!%p537_p2)  ;;  %v609_v2 = vld [vmem:[%s4753_s1 + $0x10] sm:$0xff] (!%p537_p2)  ;;  %s4761_s25 = smov (!%p537_p2), 48  }
  0x10   : > { %v3934_v5 = vpack.c.bf16 (!%p537_p2), %v608_v1, %v607_v0  ;;  %v610_v6 = vld [vmem:[%s4753_s1 + $0x18] sm:$0xff] (!%p537_p2)  ;;  %v611_v8 = vld [vmem:[%s4753_s1 + $0x20] sm:$0xff] (!%p537_p2)  ;;  %v612_v9 = vld [vmem:[%s4753_s1 + $0x28] sm:$0xff] (!%p537_p2) }
  0x11   : > { %s4766_s30 = smov (!%p590_p3, %s3497_s30), 1  ;;  %v3937_v7 = vpack.c.bf16 %v610_v6, %v609_v2  ;;  %v3940_v11 = vpack.c.bf16 %v612_v9, %v611_v8  ;;  %v613_v12 = vld [vmem:[%s4753_s1 + $0x30] sm:$0xff]  ;;  %v614_v13 = vld [vmem:[%s4753_s1 + $0x38] sm:$0xff]  ;;  %v615_v16 = vld [vmem:[%s4753_s1 + $0x40] sm:$0xff]  ;;  %3962 = vmatpush3.bf16.msra.mxu1 %v3961_v47 }
  0x12   : > { %3935 = vmatpush3.bf16.msra.mxu0 %v3934_v5  ;;  %s3502_s26 = sshll.u32 %s4766_s30, 3  ;;  %v3943_v15 = vpack.c.bf16 %v614_v13, %v613_v12  ;;  %v616_v17 = vld [vmem:[%s4753_s1 + $0x48] sm:$0xff]  ;;  %v617_v19 = vld [vmem:[%s4753_s1 + $0x50] sm:$0xff]  ;;  %v618_v20 = vld [vmem:[%s4753_s1 + $0x58] sm:$0xff]  ;;  %3742 = vmatprep.subr.mxu1 %v4096_v14 }
  0x13   : > { %3936 = vmatprep.subr.bf16.mxu0 %v4094_v4  ;;  %s593_s23 = scalar_lea.vmem %s4754_s2, %s3502_s26  ;;  %v3946_v18 = vpack.c.bf16 %v616_v17, %v615_v16  ;;  %v3949_v21 = vpack.c.bf16 %v618_v20, %v617_v19  ;;  %v619_v22 = vld [vmem:[%s4753_s1 + $0x60] sm:$0xff]  ;;  %v620_v23 = vld [vmem:[%s4753_s1 + $0x68] sm:$0xff]  ;;  %v621_v25 = vld [vmem:[%s4753_s1 + $0x70] sm:$0xff]  ;;  %s4755_s2 = sld [smem:[#allocation4_spill]] }
  0x14   : > { %v598_v10 = vld [vmem:[%s593_s23] sm:$0xff]  ;;  %v3952_v24 = vpack.c.bf16 %v620_v23, %v619_v22  ;;  %v622_v26 = vld [vmem:[%s4753_s1 + $0x78] sm:$0xff]  ;;  %s4100_s26 = smov 88   ;;  %s4744_s23 = smov 48  }
  0x15   : > { %602 = vperm.xlu0 %4038, %v598_v10   ;;  %v3955_v27 = vpack.c.bf16 %v622_v26, %v621_v25  ;;  %v3506_v52 = vld [vmem:[%s4756_s22] ss:$0 sm:$0xff]  ;;  %s4741_s22 = smov 72  }
  0x16   : > { %3938 = vmatpush3.bf16.msra.mxu0 %v3937_v7 }
  0x17   : > { %3939 = vmatprep.subr.bf16.mxu0 %v4094_v4 }
  0x19   : > { %v623_v32 = vld [vmem:[%s4755_s2] sm:$0xff]  ;;  %s4742_s2 = smov 104  }
  0x1a   : > { %3941 = vmatpush3.bf16.msra.mxu0 %v3940_v11 }
  0x1b   : > { %3942 = vmatprep.subr.bf16.mxu0 %v4094_v4 }
  0x1e   : > { %3944 = vmatpush3.bf16.msra.mxu0 %v3943_v15 }
  0x1f   : > { %3945 = vmatprep.subr.bf16.mxu0 %v4094_v4 }
  0x22   : > { %3947 = vmatpush3.bf16.msra.mxu0 %v3946_v18 }
  0x23   : > { %3948 = vmatprep.subr.bf16.mxu0 %v4094_v4 }
  0x26   : > { %3950 = vmatpush3.bf16.msra.mxu0 %v3949_v21 }
  0x27   : > { %3951 = vmatprep.subr.bf16.mxu0 %v4094_v4 }
  0x2a   : > { %3953 = vmatpush3.bf16.msra.mxu0 %v3952_v24 }
  0x2b   : > { %3954 = vmatprep.subr.bf16.mxu0 %v4094_v4 }
  0x2e   : > { %3956 = vmatpush3.bf16.msra.mxu0 %v3955_v27 }
  0x2f   : > { %3772 = vmatprep.subr.mxu0 %v4096_v14 }
  0x94   : > { %v603_v30 = vpop.permute.xlu0 %602 }
  0x95   : > { %vm604_vm1 = vcmp.eq.s32.totalorder %v603_v30, %v600_v29 }
  0x96   : > { %3729 = vmatmul.mubr.msk.f32.vlgmr.msra.gmra.mrb[0].mxu0 %vm604_vm1, %v4097_v31 }
  0x97   : > { %3774 = vmatprep.mubr.msk.f32.mxu0 %vm4095_vm0, %v4096_v14 }
 0x169   : > { %v690_v33 = vpop.f32.mrb[0].mxu0 }
 0x16a   : > { %v691_v34 = vadd.f32 %v690_v33, %v623_v32  ;;  %v3730_v35 = vpop.f32.mrb[1].mxu0 }
 0x16c   : > { %v697_v36 = vsel %vm696_vm2, %v691_v34, 0.0 }
 0x16d   : > { %698 = vadd.xlane.f32.xlu0 %v697_v36 }
 0x1fa   : > { %v699_v37 = vpop.xlane.xlu0 %698 }
 0x1fb   : > { %v701_v38 = vmul.f32 0.03125, %v699_v37 }
 0x1fd   : > { %v702_v39 = vsub.f32 %v691_v34, %v701_v38 }
 0x1ff   : > { %v703_v40 = vmul.f32 %v702_v39, %v702_v39 }
 0x201   : > { %v704_v41 = vsel %vm696_vm2, %v703_v40, 0.0 }
 0x202   : > { %705 = vadd.xlane.f32.xlu1 %v704_v41 }
 0x28f   : > { %v706_v48 = vpop.xlane.xlu1 %705 }
 0x290   : > { %v707_v49 = vmul.f32 0.03125, %v706_v48 }
 0x292   : > { %v708_v50 = vadd.f32 1e-12, %v707_v49 }
 0x294   : > { %4039 = vrsqrt.f32 %v708_v50 }
 0x29e   : > { %v4040_v51 = vpop.eup %4039 }
 0x29f   : > { %v710_v53 = vmul.f32 %v4040_v51, %v702_v39 }
 0x2a1   : > { %v717_v55 = vmul.f32 %v3506_v52, %v710_v53  ;;  %v811_v52 = vld [vmem:[%s4727_s7 + $0x10] sm:$0xff] }
 0x2a3   : > { %v4314_v56 = vadd.f32 %v3507_v54, %v717_v55 }
 0x2a5   : > { %3740 = vmatmul.mubr.msk.f32.vlgmr.msra.gmra.mrb[0].mxu1 %vm696_vm2, %v4314_v56 }
 0x2a6   : > { %3744 = vmatprep.mubr.msk.f32.mxu1 %vm4095_vm0, %v4096_v14 }
 0x378   : > { %v805_v58 = vpop.f32.mrb[0].mxu1 }
 0x379   : > { %v4323_v59 = vadd.f32 %v3508_v57, %v805_v58  ;;  %v3741_v60 = vpop.f32.mrb[1].mxu1 }
 0x37b   : > { %903 = vrot.lane.b32.xlu0 %v4323_v59, %s4746_s3  ;;  %814 = vrot.lane.b32.xlu1 %v4323_v59, %s4099_s27 }
 0x3ed   : > { %v815_v61 = vpop.permute.xlu1 %814  ;;  %v904_v62 = vpop.permute.xlu0 %903 }
 0x3ee   : > { %3743 = vmatpush3.xpose.msk.msra.mxu1 %vm816_vm3, %v815_v61 }
 0x3ef   : > { %3747 = vmatprep.subr.mxu1 %v4096_v14 }
 0x3f1   : > { %3745 = vmatmul.mubr.msk.f32.vlgmr.msra.gmra.mrb[2].mxu1 %vm816_vm3, %v4323_v59 }
 0x3f2   : > { %3748 = vmatpush3.msra.mxu1 %v904_v62  ;;  %3749 = vmatprep.mubr.msk.f32.mxu1 %vm4095_vm0, %v4096_v14 }
 0x3f3   : > { %3752 = vmatprep.subr.mxu1 %v4096_v14 }
 0x4c4   : > { %v887_v63 = vpop.f32.mrb[2].mxu1 }
 0x4c5   : > { %v891_v0 = vmul.f32 0.35355338, %v887_v63  ;;  %v3746_v1 = vpop.f32.mrb[3].mxu1 }
 0x4c7   : > { %v892_v2 = vsel %vm816_vm3, %v891_v0, -inf }
 0x4c8   : > { %893 = vmax.xlane.f32.xlu1 %v892_v2 }
 0x4d9   : > { %981 = vrot.lane.b32.xlu1 %v4323_v59, %s4100_s26 }
 0x555   : > { %v894_v3 = vpop.xlane.xlu1 %893 }
 0x556   : > { %v895_v5 = vsub.f32 %v891_v0, %v894_v3 }
 0x558   : > { %v896_v6 = vmul.f32 1.442695, %v895_v5 }
 0x559   : > { %v982_v16 = vpop.permute.xlu1 %981 }
 0x55a   : > { %4041 = vpow2.f32 %v896_v6 }
 0x564   : > { %v4042_v7 = vpop.eup %4041 }
 0x565   : > { %v898_v8 = vsel %vm816_vm3, %v4042_v7, 0.0 }
 0x566   : > { %899 = vadd.xlane.f32.xlu0 %v898_v8 }
 0x57c   : > { %979 = vrot.lane.b32.xlu0 %v4323_v59, %s4101_s28 }
 0x580   : > { %1293 = vrot.lane.b32.xlu0 %v4323_v59, %s4745_s29 }
 0x584   : > { %1291 = vrot.lane.b32.xlu0 %v4323_v59, %s4747_s20 }
 0x5f3   : > { %v900_v9 = vpop.xlane.xlu0 %899 }
 0x5f4   : > { %4043 = vrcp.f32 %v900_v9  ;;  %v812_v9 = vld [vmem:[%s4727_s7 + $0x18] sm:$0xff] }
 0x5f7   : > { %v980_v10 = vpop.permute.xlu0 %979 }
 0x5fb   : > { %v1294_v11 = vpop.permute.xlu0 %1293 }
 0x5fc   : > { %3773 = vmatpush3.xpose.msk.msra.mxu0 %vm816_vm3, %v1294_v11 }
 0x5fd   : > { %3782 = vmatprep.subr.mxu0 %v4096_v14 }
 0x5fe   : > { %v4044_v12 = vpop.eup %4043 }
 0x5ff   : > { %v902_v13 = vmul.f32 %v4044_v12, %v4042_v7  ;;  %v1292_v15 = vpop.permute.xlu0 %1291 }
 0x600   : > { %3775 = vmatmul.mubr.msk.f32.vlgmr.msra.gmra.mrb[2].mxu0 %vm816_vm3, %v1292_v15 }
 0x601   : > { %3750 = vmatmul.mubr.msk.f32.vlgmr.msra.gmra.mrb[4].mxu1 %vm816_vm3, %v902_v13  ;;  %3784 = vmatprep.mubr.msk.f32.mxu0 %vm4095_vm0, %v4096_v14 }
 0x602   : > { %3753 = vmatpush3.xpose.msk.msra.mxu1 %vm816_vm3, %v982_v16  ;;  %3754 = vmatprep.mubr.msk.f32.mxu1 %vm4095_vm0, %v4096_v14 }
 0x603   : > { %3757 = vmatprep.subr.mxu1 %v4096_v14  ;;  %3783 = vmatpush3.msra.mxu0 %v811_v52  ;;  %v1907_v52 = vld [vmem:[%s4733_s13 + $0x28] sm:$0xff] }
 0x604   : > { %3792 = vmatprep.subr.mxu0 %v4096_v14 }
 0x605   : > { %3755 = vmatmul.mubr.msk.f32.vlgmr.msra.gmra.mrb[6].mxu1 %vm816_vm3, %v980_v10 }
 0x606   : > { %3759 = vmatprep.mubr.msk.f32.mxu1 %vm4095_vm0, %v4096_v14 }
 0x6d3   : > { %v1365_v17 = vpop.f32.mrb[2].mxu0 }
 0x6d4   : > { %v975_v18 = vpop.f32.mrb[4].mxu1  ;;  %v3776_v19 = vpop.f32.mrb[3].mxu0  ;;  %v1369_v31 = vmul.f32 0.35355338, %v1365_v17 }
 0x6d5   : > { %v3751_v20 = vpop.f32.mrb[5].mxu1  ;;  %v3526_v19 = vld [vmem:[%s4728_s8] ss:$0 sm:$0xff] }
 0x6d6   : > { %v1370_v33 = vsel %vm816_vm3, %v1369_v31, -inf }
 0x6d8   : > { %v1053_v21 = vpop.f32.mrb[6].mxu1 }
 0x6d9   : > { %v1057_v22 = vmul.f32 0.35355338, %v1053_v21  ;;  %v3756_v23 = vpop.f32.mrb[7].mxu1 }
 0x6db   : > { %v1058_v24 = vsel %vm816_vm3, %v1057_v22, -inf }
 0x6dc   : > { %1059 = vmax.xlane.f32.xlu0 %v1058_v24 }
 0x6f2   : > { %1069 = vrot.lane.b32.xlu0 %v4323_v59, %s4748_s21  ;;  %s4760_s21 = smov 80  }
 0x6f6   : > { %1533 = vrot.lane.b32.xlu0 %v4323_v59, %s4741_s22  ;;  %s4763_s22 = smov 72  }
 0x6fa   : > { %1531 = vrot.lane.b32.xlu0 %v4323_v59, %s4742_s2 }
 0x769   : > { %v1060_v25 = vpop.xlane.xlu0 %1059 }
 0x76a   : > { %v1061_v26 = vsub.f32 %v1057_v22, %v1060_v25 }
 0x76c   : > { %v1062_v27 = vmul.f32 1.442695, %v1061_v26 }
 0x76d   : > { %v1070_v29 = vpop.permute.xlu0 %1069 }
 0x76e   : > { %4045 = vpow2.f32 %v1062_v27  ;;  %3758 = vmatpush3.msra.mxu1 %v1070_v29 }
 0x76f   : > { %3762 = vmatprep.subr.mxu1 %v4096_v14 }
 0x771   : > { %v1534_v50 = vpop.permute.xlu0 %1533 }
 0x775   : > { %v1532_v51 = vpop.permute.xlu0 %1531 }
 0x778   : > { %v4046_v30 = vpop.eup %4045 }
 0x779   : > { %v1064_v32 = vsel %vm816_vm3, %v4046_v30, 0.0 }
 0x77a   : > { %1065 = vadd.xlane.f32.xlu1 %v1064_v32  ;;  %v1810_v32 = vld [vmem:[%s4731_s11 + $0x8] sm:$0xff] }
 0x77e   : > { %1371 = vmax.xlane.f32.xlu1 %v1370_v33 }
 0x807   : > { %v1066_v34 = vpop.xlane.xlu1 %1065 }
 0x808   : > { %4047 = vrcp.f32 %v1066_v34  ;;  %v1812_v34 = vld [vmem:[%s4731_s11 + $0x18] sm:$0xff] }
 0x80b   : > { %v1372_v35 = vpop.xlane.xlu1 %1371 }
 0x80c   : > { %v1373_v36 = vsub.f32 %v1369_v31, %v1372_v35  ;;  %v1809_v31 = vld [vmem:[%s4731_s11] sm:$0xff] }
 0x80d   : > { %v3964_v33 = vpack.c.bf16 %v1810_v32, %v1809_v31  ;;  %v3533_v31 = vld [vmem:[%s4735_s15] ss:$0 sm:$0xff] }
 0x80e   : > { %v1374_v37 = vmul.f32 1.442695, %v1373_v36 }
 0x810   : > { %4049 = vpow2.f32 %v1374_v37 }
 0x812   : > { %v4048_v38 = vpop.eup %4047 }
 0x813   : > { %v1068_v39 = vmul.f32 %v4048_v38, %v4046_v30 }
 0x815   : > { %3760 = vmatmul.mubr.msk.f32.vlgmr.msra.gmra.mrb[8].mxu1 %vm816_vm3, %v1068_v39 }
 0x816   : > { %3764 = vmatprep.mubr.msk.f32.mxu1 %vm4095_vm0, %v4096_v14  ;;  %3763 = vmatpush3.msra.mxu1 %v810_v42  ;;  %v3528_v42 = vld [vmem:[%s4730_s10] ss:$0 sm:$0xff] }
 0x817   : > { %3767 = vmatprep.subr.mxu1 %v4096_v14 }
 0x81a   : > { %v4050_v40 = vpop.eup %4049 }
 0x81b   : > { %v1376_v41 = vsel %vm816_vm3, %v4050_v40, 0.0 }
 0x81c   : > { %1377 = vadd.xlane.f32.xlu1 %v1376_v41 }
 0x82d   : > { %1381 = vrot.lane.b32.xlu1 %v4323_v59, %s4744_s23 }
 0x8a9   : > { %v1378_v43 = vpop.xlane.xlu1 %1377 }
 0x8aa   : > { %4051 = vrcp.f32 %v1378_v43 }
 0x8ad   : > { %v1382_v48 = vpop.permute.xlu1 %1381 }
 0x8b4   : > { %v4052_v47 = vpop.eup %4051 }
 0x8b5   : > { %v1380_v49 = vmul.f32 %v4052_v47, %v4050_v40  ;;  %v3527_v40 = vld [vmem:[%s4729_s9] ss:$0 sm:$0xff] }
 0x8e8   : > { %v1141_v45 = vpop.f32.mrb[8].mxu1 }
 0x8e9   : > { %v3761_v46 = vpop.f32.mrb[9].mxu1  ;;  %3765 = vmatmul.mubr.msk.f32.vlgmr.msra.gmra.mrb[10].mxu1 %vm816_vm3, %v1141_v45  ;;  %v1902_v45 = vld [vmem:[%s4733_s13] sm:$0xff] }
 0x8ea   : > { %3768 = vmatpush3.msra.mxu1 %v809_v44  ;;  %3769 = vmatprep.mubr.msk.f32.mxu1 %vm4095_vm0, %v4096_v14  ;;  %v1903_v46 = vld [vmem:[%s4733_s13 + $0x8] sm:$0xff] }
 0x8eb   : > { %3777 = vmatprep.subr.mxu1 %v4096_v14  ;;  %v3970_v47 = vpack.c.bf16 %v1903_v46, %v1902_v45 }
 0x8ed   : > { %3770 = vmatmul.mubr.msk.f32.vlgmr.msra.gmra.mrb[12].mxu1 %vm816_vm3, %v975_v18 }
 0x8ee   : > { %3778 = vmatpush3.msra.mxu1 %v1382_v48  ;;  %3779 = vmatprep.mubr.msk.f32.mxu1 %vm4095_vm0, %v4096_v14  ;;  %v1904_v48 = vld [vmem:[%s4733_s13 + $0x10] sm:$0xff] }
 0x8ef   : > { %3787 = vmatprep.subr.mxu1 %v4096_v14 }
 0x8f1   : > { %3780 = vmatmul.mubr.msk.f32.vlgmr.msra.gmra.mrb[14].mxu1 %vm816_vm3, %v1380_v49  ;;  %v1905_v49 = vld [vmem:[%s4733_s13 + $0x18] sm:$0xff] }
 0x8f2   : > { %3789 = vmatprep.mubr.msk.f32.mxu1 %vm4095_vm0, %v4096_v14 }
 0x8f5   : > { %3788 = vmatpush3.xpose.msk.msra.mxu1 %vm816_vm3, %v1534_v50  ;;  %v3973_v50 = vpack.c.bf16 %v1905_v49, %v1904_v48 }
 0x8f6   : > { %3797 = vmatprep.subr.mxu1 %v4096_v14 }
 0x8f8   : > { %3790 = vmatmul.mubr.msk.f32.vlgmr.msra.gmra.mrb[16].mxu1 %vm816_vm3, %v1532_v51  ;;  %v1906_v51 = vld [vmem:[%s4733_s13 + $0x20] sm:$0xff] }
 0x8f9   : > { %3799 = vmatprep.mubr.msk.f32.mxu1 %vm4095_vm0, %v4096_v14  ;;  %3798 = vmatpush3.msra.mxu1 %v812_v9  ;;  %v3531_v9 = vld [vmem:[%s4734_s14] ss:$0 sm:$0xff] }
 0x8fa   : > { %3969 = vmatprep.subr.bf16.mxu1 %v4094_v4 }
 0x9bc   : > { %v1214_v53 = vpop.f32.mrb[10].mxu1 }
 0x9bd   : > { %v3766_v54 = vpop.f32.mrb[11].mxu1 }
 0x9be   : > { %v1908_v54 = vld [vmem:[%s4733_s13 + $0x30] sm:$0xff] }
 0x9c0   : > { %v1287_v55 = vpop.f32.mrb[12].mxu1 }
 0x9c1   : > { %v1288_v57 = vadd.f32 %v1287_v55, %v1214_v53  ;;  %v3771_v58 = vpop.f32.mrb[13].mxu1  ;;  %v3976_v53 = vpack.c.bf16 %v1907_v52, %v1906_v51  ;;  %v1909_v55 = vld [vmem:[%s4733_s13 + $0x38] sm:$0xff] }
 0x9c2   : > { %v3529_v58 = vld [vmem:[%s4732_s12] ss:$0 sm:$0xff] }
 0x9c4   : > { %v1453_v60 = vpop.f32.mrb[14].mxu1 }
 0x9c5   : > { %v3781_v61 = vpop.f32.mrb[15].mxu1  ;;  %3785 = vmatmul.mubr.msk.f32.vlgmr.msra.gmra.mrb[4].mxu0 %vm816_vm3, %v1453_v60 }
 0x9c6   : > { %3794 = vmatprep.mubr.msk.f32.mxu0 %vm4095_vm0, %v4096_v14 }
 0x9cb   : > { %v1605_v62 = vpop.f32.mrb[16].mxu1 }
 0x9cc   : > { %v1609_v63 = vmul.f32 0.35355338, %v1605_v62  ;;  %v3791_v0 = vpop.f32.mrb[17].mxu1 }
 0x9ce   : > { %v1610_v1 = vsel %vm816_vm3, %v1609_v63, -inf }
 0x9cf   : > { %1611 = vmax.xlane.f32.xlu0 %v1610_v1 }
 0x9e5   : > { %1621 = vrot.lane.b32.xlu0 %v4323_v59, %s4743_s24  ;;  %s4762_s24 = smov 104  }
 0xa5c   : > { %v1612_v2 = vpop.xlane.xlu0 %1611 }
 0xa5d   : > { %v1613_v3 = vsub.f32 %v1609_v63, %v1612_v2 }
 0xa5f   : > { %v1614_v5 = vmul.f32 1.442695, %v1613_v3 }
 0xa60   : > { %v1622_v6 = vpop.permute.xlu0 %1621 }
 0xa61   : > { %4053 = vpow2.f32 %v1614_v5  ;;  %3793 = vmatpush3.msra.mxu0 %v1622_v6 }
 0xa62   : > { %3963 = vmatprep.subr.bf16.mxu0 %v4094_v4 }
 0xa6b   : > { %v4054_v7 = vpop.eup %4053 }
 0xa6c   : > { %v1616_v8 = vsel %vm816_vm3, %v4054_v7, 0.0 }
 0xa6d   : > { %1617 = vadd.xlane.f32.xlu1 %v1616_v8 }
 0xa98   : > { %v1526_v59 = vpop.f32.mrb[4].mxu0 }
 0xa99   : > { %v1530_v10 = vadd.f32 %v1526_v59, %v1288_v57  ;;  %v3786_v11 = vpop.f32.mrb[5].mxu0  ;;  %v3979_v57 = vpack.c.bf16 %v1909_v55, %v1908_v54 }
 0xafa   : > { %v1618_v12 = vpop.xlane.xlu1 %1617 }
 0xafb   : > { %4055 = vrcp.f32 %v1618_v12 }
 0xb05   : > { %v4056_v13 = vpop.eup %4055 }
 0xb06   : > { %v1620_v15 = vmul.f32 %v4056_v13, %v4054_v7 }
 0xb08   : > { %3795 = vmatmul.mubr.msk.f32.vlgmr.msra.gmra.mrb[6].mxu0 %vm816_vm3, %v1620_v15 }
 0xb09   : > { %3810 = vmatprep.mubr.msk.f32.mxu0 %vm4095_vm0, %v4096_v14  ;;  %3965 = vmatpush3.bf16.msra.mxu0 %v3964_v33  ;;  %v3534_v33 = vld [vmem:[%s4736_s16] ss:$0 sm:$0xff] }
 0xb0a   : > { %3966 = vmatprep.subr.bf16.mxu0 %v4094_v4 }
 0xbdb   : > { %v1693_v16 = vpop.f32.mrb[6].mxu0 }
 0xbdc   : > { %v3796_v17 = vpop.f32.mrb[7].mxu0  ;;  %3800 = vmatmul.mubr.msk.f32.vlgmr.msra.gmra.mrb[18].mxu1 %vm816_vm3, %v1693_v16 }
 0xbdd   : > { %3829 = vmatprep.mubr.msk.f32.mxu1 %vm4095_vm0, %v4096_v14  ;;  %3971 = vmatpush3.bf16.msra.mxu1 %v3970_v47 }
 0xbde   : > { %3972 = vmatprep.subr.bf16.mxu1 %v4094_v4 }
 0xbe1   : > { %3974 = vmatpush3.bf16.msra.mxu1 %v3973_v50 }
 0xbe2   : > { %3975 = vmatprep.subr.bf16.mxu1 %v4094_v4 }
 0xbe5   : > { %3977 = vmatpush3.bf16.msra.mxu1 %v3976_v53 }
 0xbe6   : > { %3978 = vmatprep.subr.bf16.mxu1 %v4094_v4 }
 0xbe9   : > { %3980 = vmatpush3.bf16.msra.mxu1 %v3979_v57 }
 0xbea   : > { %3848 = vmatprep.subr.mxu1 %v4096_v14 }
 0xcaf   : > { %v1766_v18 = vpop.f32.mrb[18].mxu1 }
 0xcb0   : > { %v1770_v20 = vadd.f32 %v1766_v18, %v1530_v10  ;;  %v3801_v21 = vpop.f32.mrb[19].mxu1 }
 0xcb1   : > { %v3536_v21 = vld [vmem:[%s4725_s5 + $0x28] sm:$0xff] }
 0xcb2   : > { %v1778_v22 = vadd.f32 %v3526_v19, %v1770_v20  ;;  %v3535_v20 = vld [vmem:[%s4725_s5 + $0x20] sm:$0xff] }
 0xcb4   : > { %v1779_v23 = vadd.f32 %v1778_v22, %v4314_v56  ;;  %v1811_v56 = vld [vmem:[%s4731_s11 + $0x10] sm:$0xff]  ;;  %v3982_v22 = vpack.c.bf16 %v3536_v21, %v3535_v20 }
 0xcb5   : > { %v3967_v35 = vpack.c.bf16 %v1812_v34, %v1811_v56 }
 0xcb6   : > { %v1782_v24 = vsel %vm696_vm2, %v1779_v23, 0.0 }
 0xcb7   : > { %1783 = vadd.xlane.f32.xlu1 %v1782_v24  ;;  %3968 = vmatpush3.bf16.msra.mxu0 %v3967_v35  ;;  %v3538_v24 = vld [vmem:[%s4725_s5 + $0x38] sm:$0xff]  ;;  %v3540_v35 = vld [vmem:[%s4726_s6 + $0x1] ss:$0 sm:$0xff] }
 0xcb8   : > { %3981 = vmatprep.subr.bf16.mxu0 %v4094_v4 }
 0xd44   : > { %v1784_v25 = vpop.xlane.xlu1 %1783 }
 0xd45   : > { %v1785_v26 = vmul.f32 0.03125, %v1784_v25 }
 0xd47   : > { %v1786_v27 = vsub.f32 %v1779_v23, %v1785_v26  ;;  %v3537_v23 = vld [vmem:[%s4725_s5 + $0x30] sm:$0xff] }
 0xd48   : > { %v3985_v25 = vpack.c.bf16 %v3538_v24, %v3537_v23 }
 0xd49   : > { %v1787_v29 = vmul.f32 %v1786_v27, %v1786_v27 }
 0xd4b   : > { %v1788_v30 = vsel %vm696_vm2, %v1787_v29, 0.0 }
 0xd4c   : > { %1789 = vadd.xlane.f32.xlu1 %v1788_v30 }
 0xdd9   : > { %v1790_v36 = vpop.xlane.xlu1 %1789 }
 0xdda   : > { %v1791_v37 = vmul.f32 0.03125, %v1790_v36 }
 0xddc   : > { %v1792_v38 = vadd.f32 1e-12, %v1791_v37 }
 0xdde   : > { %4057 = vrsqrt.f32 %v1792_v38 }
 0xde8   : > { %v4058_v39 = vpop.eup %4057 }
 0xde9   : > { %v1794_v41 = vmul.f32 %v4058_v39, %v1786_v27 }
 0xdeb   : > { %v1801_v43 = vmul.f32 %v3527_v40, %v1794_v41 }
 0xded   : > { %v1808_v44 = vadd.f32 %v3528_v42, %v1801_v43 }
 0xdef   : > { %3811 = vmatmul.mubr.msk.f32.vlgmr.msra.gmra.mrb[8].mxu0 %vm696_vm2, %v1808_v44 }
 0xdf0   : > { %3840 = vmatprep.mubr.msk.f32.mxu0 %vm4095_vm0, %v4096_v14  ;;  %3983 = vmatpush3.bf16.msra.mxu0 %v3982_v22 }
 0xdf1   : > { %3984 = vmatprep.subr.bf16.mxu0 %v4094_v4 }
 0xdf4   : > { %3986 = vmatpush3.bf16.msra.mxu0 %v3985_v25 }
 0xdf5   : > { %3843 = vmatprep.subr.mxu0 %v4096_v14 }
 0xec2   : > { %v1889_v60 = vpop.f32.mrb[8].mxu0 }
 0xec3   : > { %v1890_v61 = vadd.f32 %v3529_v58, %v1889_v60  ;;  %v3812_v62 = vpop.f32.mrb[9].mxu0 }
 0xec4   : > { %v3543_v62 = vld [vmem:[%s4727_s7 + $0x28] sm:$0xff] }
 0xec5   : > { %v1894_v63 = vmul.f32 0.044715, %v1890_v61  ;;  %v1893_v6 = vmul.f32 0.5, %v1890_v61 }
 0xec7   : > { %v1895_v0 = vmul.f32 %v1894_v63, %v1890_v61 }
 0xec9   : > { %v1896_v1 = vmul.f32 %v1895_v0, %v1890_v61 }
 0xecb   : > { %v1897_v2 = vadd.f32 %v1896_v1, %v1890_v61 }
 0xecd   : > { %v1898_v3 = vmul.f32 0.7978846, %v1897_v2 }
 0xecf   : > { %4059 = vtanh.f32 %v1898_v3 }
 0xed9   : > { %v4060_v5 = vpop.eup %4059 }
 0xeda   : > { %v1900_v7 = vadd.f32 1.0, %v4060_v5 }
 0xedc   : > { %v1901_v8 = vmul.f32 %v1900_v7, %v1893_v6 }
 0xede   : > { %3830 = vmatmul.mubr.msk.f32.vlgmr.msra.gmra.mrb[20].mxu1 %vm1917_vm4, %v1901_v8  ;;  %v3542_v8 = vld [vmem:[%s4727_s7 + $0x20] sm:$0xff] }
 0xedf   : > { %3850 = vmatprep.mubr.msk.f32.mxu1 %vm4095_vm0, %v4096_v14 }
 0xfb1   : > { %v1987_v59 = vpop.f32.mrb[20].mxu1 }
 0xfb2   : > { %v1988_v10 = vadd.f32 %v3531_v9, %v1987_v59  ;;  %v3831_v11 = vpop.f32.mrb[21].mxu1 }
 0xfb4   : > { %v1991_v12 = vadd.f32 %v1988_v10, %v1808_v44 }
 0xfb6   : > { %v1994_v13 = vsel %vm696_vm2, %v1991_v12, 0.0 }
 0xfb7   : > { %1995 = vadd.xlane.f32.xlu1 %v1994_v13 }
0x1044   : > { %v1996_v15 = vpop.xlane.xlu1 %1995 }
0x1045   : > { %v1997_v16 = vmul.f32 0.03125, %v1996_v15 }
0x1047   : > { %v1998_v17 = vsub.f32 %v1991_v12, %v1997_v16 }
0x1049   : > { %v1999_v18 = vmul.f32 %v1998_v17, %v1998_v17 }
0x104b   : > { %v2000_v19 = vsel %vm696_vm2, %v1999_v18, 0.0 }
0x104c   : > { %2001 = vadd.xlane.f32.xlu1 %v2000_v19 }
0x10d9   : > { %v2002_v26 = vpop.xlane.xlu1 %2001 }
0x10da   : > { %v2003_v27 = vmul.f32 0.03125, %v2002_v26 }
0x10dc   : > { %v2004_v29 = vadd.f32 1e-12, %v2003_v27 }
0x10de   : > { %4061 = vrsqrt.f32 %v2004_v29 }
0x10e8   : > { %v4062_v30 = vpop.eup %4061 }
0x10e9   : > { %v2006_v32 = vmul.f32 %v4062_v30, %v1998_v17 }
0x10eb   : > { %v2013_v56 = vmul.f32 %v3533_v31, %v2006_v32 }
0x10ed   : > { %v4508_v34 = vadd.f32 %v3534_v33, %v2013_v56 }
0x10ef   : > { %3841 = vmatmul.mubr.msk.f32.vlgmr.msra.gmra.mrb[10].mxu0 %vm696_vm2, %v4508_v34 }
0x10f0   : > { %3845 = vmatprep.mubr.msk.f32.mxu0 %vm4095_vm0, %v4096_v14 }
0x11c2   : > { %v2103_v36 = vpop.f32.mrb[10].mxu0 }
0x11c3   : > { %v4517_v37 = vadd.f32 %v3540_v35, %v2103_v36  ;;  %v3842_v38 = vpop.f32.mrb[11].mxu0  ;;  %v3544_v36 = vld [vmem:[%s4727_s7 + $0x30] sm:$0xff] }
0x11c5   : > { %2279 = vrot.lane.b32.xlu1 %v4517_v37, %s4100_s26  ;;  %2113 = vrot.lane.b32.xlu0 %v4517_v37, %s4099_s27  ;;  %s4757_s27 = smov 56   ;;  %s4758_s26 = smov 112  }
0x11c9   : > { %2277 = vrot.lane.b32.xlu0 %v4517_v37, %s4101_s28  ;;  %s4759_s28 = smov 64  }
0x1237   : > { %v2114_v39 = vpop.permute.xlu0 %2113  ;;  %v2280_v40 = vpop.permute.xlu1 %2279 }
0x1238   : > { %3844 = vmatpush3.xpose.msk.msra.mxu0 %vm816_vm3, %v2114_v39 }
0x1239   : > { %3853 = vmatprep.subr.mxu0 %v4096_v14 }
0x123b   : > { %3846 = vmatmul.mubr.msk.f32.vlgmr.msra.gmra.mrb[12].mxu0 %vm816_vm3, %v4517_v37  ;;  %v2278_v41 = vpop.permute.xlu0 %2277 }
0x123c   : > { %3854 = vmatpush3.xpose.msk.msra.mxu0 %vm816_vm3, %v2280_v40  ;;  %3855 = vmatprep.mubr.msk.f32.mxu0 %vm4095_vm0, %v4096_v14 }
0x123d   : > { %3863 = vmatprep.subr.mxu0 %v4096_v14 }
0x123f   : > { %3856 = vmatmul.mubr.msk.f32.vlgmr.msra.gmra.mrb[14].mxu0 %vm816_vm3, %v2278_v41 }
0x1240   : > { %3865 = vmatprep.mubr.msk.f32.mxu0 %vm4095_vm0, %v4096_v14  ;;  %3864 = vmatpush3.msra.mxu0 %v3543_v62 }
0x1241   : > { %3873 = vmatprep.subr.mxu0 %v4096_v14 }
0x130e   : > { %v2185_v42 = vpop.f32.mrb[12].mxu0 }
0x130f   : > { %v2189_v43 = vmul.f32 0.35355338, %v2185_v42  ;;  %v3847_v44 = vpop.f32.mrb[13].mxu0 }
0x1311   : > { %v2190_v45 = vsel %vm816_vm3, %v2189_v43, -inf }
0x1312   : > { %2191 = vmax.xlane.f32.xlu0 %v2190_v45  ;;  %v2351_v46 = vpop.f32.mrb[14].mxu0 }
0x1313   : > { %v2355_v47 = vmul.f32 0.35355338, %v2351_v46  ;;  %v3857_v48 = vpop.f32.mrb[15].mxu0 }
0x1315   : > { %v2356_v49 = vsel %vm816_vm3, %v2355_v47, -inf }
0x1316   : > { %2357 = vmax.xlane.f32.xlu1 %v2356_v49  ;;  %v3545_v49 = vld [vmem:[%s4727_s7 + $0x38] sm:$0xff] }
0x1327   : > { %2367 = vrot.lane.b32.xlu1 %v4517_v37, %s4757_s27  ;;  %s3503_s27 = sshll.u32 %s4766_s30, 1 }
0x132b   : > { %2589 = vrot.lane.b32.xlu1 %v4517_v37, %s4758_s26  ;;  %s4764_s26 = smov 40  }
0x139f   : > { %v2192_v50 = vpop.xlane.xlu0 %2191 }
0x13a0   : > { %v2193_v51 = vsub.f32 %v2189_v43, %v2192_v50 }
0x13a2   : > { %v2194_v52 = vmul.f32 1.442695, %v2193_v51 }
0x13a3   : > { %v2358_v53 = vpop.xlane.xlu1 %2357 }
0x13a4   : > { %4063 = vpow2.f32 %v2194_v52  ;;  %v2359_v54 = vsub.f32 %v2355_v47, %v2358_v53 }
0x13a6   : > { %v2360_v55 = vmul.f32 1.442695, %v2359_v54 }
0x13a7   : > { %v2368_v5 = vpop.permute.xlu1 %2367 }
0x13a8   : > { %4065 = vpow2.f32 %v2360_v55 }
0x13ab   : > { %v2590_v13 = vpop.permute.xlu1 %2589 }
0x13ae   : > { %v4064_v57 = vpop.eup %4063 }
0x13af   : > { %v2196_v58 = vsel %vm816_vm3, %v4064_v57, 0.0 }
0x13b0   : > { %2197 = vadd.xlane.f32.xlu0 %v2196_v58 }
0x13b2   : > { %v4066_v60 = vpop.eup %4065 }
0x13b3   : > { %v2362_v61 = vsel %vm816_vm3, %v4066_v60, 0.0 }
0x13b4   : > { %2363 = vadd.xlane.f32.xlu0 %v2362_v61  ;;  %v3563_v61 = vld [vmem:[%s4728_s8 + $0x1] ss:$0 sm:$0xff] }
0x13ca   : > { %2201 = vrot.lane.b32.xlu0 %v4517_v37, %s4759_s28 }
0x13ce   : > { %2591 = vrot.lane.b32.xlu0 %v4517_v37, %s4760_s21  ;;  %s597_s21 = scalar_lea.vmem %s4739_s19, %s3503_s27 }
0x143d   : > { %v2198_v63 = vpop.xlane.xlu0 %2197 }
0x143e   : > { %4067 = vrcp.f32 %v2198_v63 }
0x1441   : > { %v2364_v0 = vpop.xlane.xlu0 %2363 }
0x1442   : > { %4069 = vrcp.f32 %v2364_v0 }
0x1445   : > { %v2202_v1 = vpop.permute.xlu0 %2201 }
0x1446   : > { %3849 = vmatpush3.msra.mxu1 %v2202_v1 }
0x1447   : > { %3858 = vmatprep.subr.mxu1 %v4096_v14 }
0x1448   : > { %v4068_v2 = vpop.eup %4067 }
0x1449   : > { %v2200_v3 = vmul.f32 %v4068_v2, %v4064_v57  ;;  %v2592_v11 = vpop.permute.xlu0 %2591 }
0x144b   : > { %3851 = vmatmul.mubr.msk.f32.vlgmr.msra.gmra.mrb[22].mxu1 %vm816_vm3, %v2200_v3 }
0x144c   : > { %v4070_v6 = vpop.eup %4069  ;;  %3859 = vmatpush3.msra.mxu1 %v2368_v5  ;;  %3860 = vmatprep.mubr.msk.f32.mxu1 %vm4095_vm0, %v4096_v14 }
0x144d   : > { %v2366_v7 = vmul.f32 %v4070_v6, %v4066_v60  ;;  %3868 = vmatprep.subr.mxu1 %v4096_v14 }
0x144f   : > { %3861 = vmatmul.mubr.msk.f32.vlgmr.msra.gmra.mrb[24].mxu1 %vm816_vm3, %v2366_v7 }
0x1450   : > { %3870 = vmatprep.mubr.msk.f32.mxu1 %vm4095_vm0, %v4096_v14  ;;  %3869 = vmatpush3.msra.mxu1 %v3542_v8 }
0x1451   : > { %3878 = vmatprep.subr.mxu1 %v4096_v14 }
0x151e   : > { %v2273_v9 = vpop.f32.mrb[22].mxu1 }
0x151f   : > { %v3852_v59 = vpop.f32.mrb[23].mxu1  ;;  %3871 = vmatmul.mubr.msk.f32.vlgmr.msra.gmra.mrb[26].mxu1 %vm816_vm3, %v2273_v9  ;;  %v3568_v9 = vld [vmem:[%s4731_s11 + $0x20] sm:$0xff] }
0x1520   : > { %3880 = vmatprep.mubr.msk.f32.mxu1 %vm4095_vm0, %v4096_v14  ;;  %v3569_v59 = vld [vmem:[%s4731_s11 + $0x28] sm:$0xff] }
0x1522   : > { %v2439_v10 = vpop.f32.mrb[24].mxu1 }
0x1523   : > { %v3862_v12 = vpop.f32.mrb[25].mxu1  ;;  %3866 = vmatmul.mubr.msk.f32.vlgmr.msra.gmra.mrb[16].mxu0 %vm816_vm3, %v2439_v10  ;;  %v3988_v10 = vpack.c.bf16 %v3569_v59, %v3568_v9 }
0x1524   : > { %3874 = vmatpush3.xpose.msk.msra.mxu0 %vm816_vm3, %v2592_v11  ;;  %3875 = vmatprep.mubr.msk.f32.mxu0 %vm4095_vm0, %v4096_v14  ;;  %v3571_v11 = vld [vmem:[%s4731_s11 + $0x38] sm:$0xff] }
0x1525   : > { %3883 = vmatprep.subr.mxu0 %v4096_v14 }
0x1527   : > { %3876 = vmatmul.mubr.msk.f32.vlgmr.msra.gmra.mrb[18].mxu0 %vm816_vm3, %v2590_v13 }
0x1528   : > { %3885 = vmatprep.mubr.msk.f32.mxu0 %vm4095_vm0, %v4096_v14  ;;  %3884 = vmatpush3.msra.mxu0 %v3544_v36 }
0x1529   : > { %3893 = vmatprep.subr.mxu0 %v4096_v14 }
0x15f2   : > { %v2585_v15 = vpop.f32.mrb[26].mxu1 }
0x15f3   : > { %v3872_v16 = vpop.f32.mrb[27].mxu1 }
0x15f6   : > { %v2512_v17 = vpop.f32.mrb[16].mxu0 }
0x15f7   : > { %v2586_v18 = vadd.f32 %v2585_v15, %v2512_v17  ;;  %v3867_v19 = vpop.f32.mrb[17].mxu0 }
0x15fa   : > { %v2663_v20 = vpop.f32.mrb[18].mxu0 }
0x15fb   : > { %v2667_v21 = vmul.f32 0.35355338, %v2663_v20  ;;  %v3877_v22 = vpop.f32.mrb[19].mxu0  ;;  %v3567_v20 = vld [vmem:[%s4730_s10 + $0x1] ss:$0 sm:$0xff] }
0x15fd   : > { %v2668_v23 = vsel %vm816_vm3, %v2667_v21, -inf }
0x15fe   : > { %2669 = vmax.xlane.f32.xlu0 %v2668_v23  ;;  %v3575_v23 = vld [vmem:[%s4733_s13 + $0x40] sm:$0xff] }
0x1614   : > { %2679 = vrot.lane.b32.xlu0 %v4517_v37, %s4761_s25 }
0x1618   : > { %2829 = vrot.lane.b32.xlu0 %v4517_v37, %s4762_s24 }
0x168b   : > { %v2670_v24 = vpop.xlane.xlu0 %2669 }
0x168c   : > { %v2671_v25 = vsub.f32 %v2667_v21, %v2670_v24  ;;  %v3576_v24 = vld [vmem:[%s4733_s13 + $0x48] sm:$0xff] }
0x168e   : > { %v2672_v26 = vmul.f32 1.442695, %v2671_v25  ;;  %v3994_v25 = vpack.c.bf16 %v3576_v24, %v3575_v23 }
0x168f   : > { %v2680_v27 = vpop.permute.xlu0 %2679 }
0x1690   : > { %4071 = vpow2.f32 %v2672_v26  ;;  %3879 = vmatpush3.msra.mxu1 %v2680_v27  ;;  %v3577_v26 = vld [vmem:[%s4733_s13 + $0x50] sm:$0xff]  ;;  %v3578_v27 = vld [vmem:[%s4733_s13 + $0x58] sm:$0xff] }
0x1691   : > { %3888 = vmatprep.subr.mxu1 %v4096_v14 }
0x1693   : > { %v2830_v35 = vpop.permute.xlu0 %2829 }
0x169a   : > { %v4072_v29 = vpop.eup %4071 }
0x169b   : > { %v2674_v30 = vsel %vm816_vm3, %v4072_v29, 0.0 }
0x169c   : > { %2675 = vadd.xlane.f32.xlu1 %v2674_v30  ;;  %v3580_v30 = vld [vmem:[%s4733_s13 + $0x68] sm:$0xff] }
0x16ad   : > { %2831 = vrot.lane.b32.xlu1 %v4517_v37, %s4763_s22 }
0x1729   : > { %v2676_v31 = vpop.xlane.xlu1 %2675 }
0x172a   : > { %4073 = vrcp.f32 %v2676_v31 }
0x172d   : > { %v2832_v56 = vpop.permute.xlu1 %2831 }
0x1734   : > { %v4074_v32 = vpop.eup %4073 }
0x1735   : > { %v2678_v33 = vmul.f32 %v4074_v32, %v4072_v29  ;;  %v3997_v29 = vpack.c.bf16 %v3578_v27, %v3577_v26  ;;  %v3581_v32 = vld [vmem:[%s4733_s13 + $0x70] sm:$0xff] }
0x1737   : > { %3881 = vmatmul.mubr.msk.f32.vlgmr.msra.gmra.mrb[28].mxu1 %vm816_vm3, %v2678_v33  ;;  %v3582_v33 = vld [vmem:[%s4733_s13 + $0x78] sm:$0xff] }
0x1738   : > { %3889 = vmatpush3.xpose.msk.msra.mxu1 %vm816_vm3, %v2832_v56  ;;  %3890 = vmatprep.mubr.msk.f32.mxu1 %vm4095_vm0, %v4096_v14  ;;  %v4003_v56 = vpack.c.bf16 %v3582_v33, %v3581_v32 }
0x1739   : > { %3898 = vmatprep.subr.mxu1 %v4096_v14 }
0x173b   : > { %3891 = vmatmul.mubr.msk.f32.vlgmr.msra.gmra.mrb[30].mxu1 %vm816_vm3, %v2830_v35  ;;  %v3573_v35 = vld [vmem:[%s4732_s12 + $0x1] ss:$0 sm:$0xff] }
0x173c   : > { %3900 = vmatprep.mubr.msk.f32.mxu1 %vm4095_vm0, %v4096_v14  ;;  %3899 = vmatpush3.msra.mxu1 %v3545_v49 }
0x173d   : > { %3993 = vmatprep.subr.bf16.mxu1 %v4094_v4 }
0x180a   : > { %v2751_v38 = vpop.f32.mrb[28].mxu1 }
0x180b   : > { %v3882_v39 = vpop.f32.mrb[29].mxu1  ;;  %3886 = vmatmul.mubr.msk.f32.vlgmr.msra.gmra.mrb[20].mxu0 %vm816_vm3, %v2751_v38 }
0x180c   : > { %3895 = vmatprep.mubr.msk.f32.mxu0 %vm4095_vm0, %v4096_v14 }
0x180e   : > { %v2903_v40 = vpop.f32.mrb[30].mxu1 }
0x180f   : > { %v2907_v41 = vmul.f32 0.35355338, %v2903_v40  ;;  %v3892_v42 = vpop.f32.mrb[31].mxu1 }
0x1811   : > { %v2908_v43 = vsel %vm816_vm3, %v2907_v41, -inf }
0x1812   : > { %2909 = vmax.xlane.f32.xlu1 %v2908_v43 }
0x189f   : > { %v2910_v44 = vpop.xlane.xlu1 %2909 }
0x18a0   : > { %v2911_v45 = vsub.f32 %v2907_v41, %v2910_v44 }
0x18a2   : > { %v2912_v46 = vmul.f32 1.442695, %v2911_v45 }
0x18a4   : > { %4075 = vpow2.f32 %v2912_v46 }
0x18ae   : > { %v4076_v47 = vpop.eup %4075 }
0x18af   : > { %v2914_v48 = vsel %vm816_vm3, %v4076_v47, 0.0 }
0x18b0   : > { %2915 = vadd.xlane.f32.xlu0 %v2914_v48 }
0x18c6   : > { %2919 = vrot.lane.b32.xlu0 %v4517_v37, %s4764_s26 }
0x18de   : > { %v2824_v50 = vpop.f32.mrb[20].mxu0 }
0x18df   : > { %v2828_v51 = vadd.f32 %v2824_v50, %v2586_v18  ;;  %v3887_v52 = vpop.f32.mrb[21].mxu0  ;;  %v3566_v18 = vld [vmem:[%s4729_s9 + $0x1] ss:$0 sm:$0xff] }
0x193d   : > { %v2916_v53 = vpop.xlane.xlu0 %2915 }
0x193e   : > { %4077 = vrcp.f32 %v2916_v53 }
0x1941   : > { %v2920_v54 = vpop.permute.xlu0 %2919 }
0x1942   : > { %3894 = vmatpush3.msra.mxu0 %v2920_v54 }
0x1943   : > { %3987 = vmatprep.subr.bf16.mxu0 %v4094_v4 }
0x1948   : > { %v4078_v55 = vpop.eup %4077 }
0x1949   : > { %v2918_v57 = vmul.f32 %v4078_v55, %v4076_v47 }
0x194b   : > { %3896 = vmatmul.mubr.msk.f32.vlgmr.msra.gmra.mrb[22].mxu0 %vm816_vm3, %v2918_v57 }
0x194c   : > { %3911 = vmatprep.mubr.msk.f32.mxu0 %vm4095_vm0, %v4096_v14  ;;  %3989 = vmatpush3.bf16.msra.mxu0 %v3988_v10 }
0x194d   : > { %3990 = vmatprep.subr.bf16.mxu0 %v4094_v4 }
0x1a1e   : > { %v2991_v37 = vpop.f32.mrb[22].mxu0 }
0x1a1f   : > { %v3897_v58 = vpop.f32.mrb[23].mxu0  ;;  %3901 = vmatmul.mubr.msk.f32.vlgmr.msra.gmra.mrb[32].mxu1 %vm816_vm3, %v2991_v37 }
0x1a20   : > { %3930 = vmatprep.mubr.msk.f32.mxu1 %vm4095_vm0, %v4096_v14  ;;  %3995 = vmatpush3.bf16.msra.mxu1 %v3994_v25 }
0x1a21   : > { %3996 = vmatprep.subr.bf16.mxu1 %v4094_v4 }
0x1a24   : > { %3998 = vmatpush3.bf16.msra.mxu1 %v3997_v29 }
0x1a25   : > { %3999 = vmatprep.subr.bf16.mxu1 %v4094_v4 }
0x1af2   : > { %v3064_v60 = vpop.f32.mrb[32].mxu1 }
0x1af3   : > { %v3068_v62 = vadd.f32 %v3064_v60, %v2828_v51  ;;  %v3902_v63 = vpop.f32.mrb[33].mxu1  ;;  %v3328_v60 = vld [vmem:[%s4737_s17 + $0x8] sm:$0xff] }
0x1af4   : > { %v3327_v63 = vld [vmem:[%s4737_s17] sm:$0xff] }
0x1af5   : > { %v3077_v0 = vadd.f32 %v3563_v61, %v3068_v62  ;;  %v3330_v61 = vld [vmem:[%s4737_s17 + $0x18] sm:$0xff] }
0x1af6   : > { %v4005_v62 = vpack.c.bf16 %v3330_v61, %v3328_v60 }
0x1af7   : > { %v3078_v1 = vadd.f32 %v3077_v0, %v4508_v34  ;;  %v3570_v34 = vld [vmem:[%s4731_s11 + $0x30] sm:$0xff] }
0x1af8   : > { %v3991_v12 = vpack.c.bf16 %v3571_v11, %v3570_v34  ;;  %v3329_v0 = vld [vmem:[%s4737_s17 + $0x10] sm:$0xff]  ;;  %v3588_v11 = vld [vmem:[%s4735_s15 + $0x1] ss:$0 sm:$0xff] }
0x1af9   : > { %v3083_v2 = vsel %vm696_vm2, %v3078_v1, 0.0 }
0x1afa   : > { %3084 = vadd.xlane.f32.xlu1 %v3083_v2  ;;  %3992 = vmatpush3.bf16.msra.mxu0 %v3991_v12  ;;  %v3332_v2 = vld [vmem:[%s4737_s17 + $0x28] sm:$0xff] }
0x1afb   : > { %4006 = vmatprep.subr.bf16.mxu0 %v4005_v62 }
0x1b87   : > { %v3085_v3 = vpop.xlane.xlu1 %3084 }
0x1b88   : > { %v3086_v5 = vmul.f32 0.03125, %v3085_v3  ;;  %v3334_v3 = vld [vmem:[%s4737_s17 + $0x38] sm:$0xff] }
0x1b8a   : > { %v3087_v6 = vsub.f32 %v3078_v1, %v3086_v5  ;;  %v4007_v1 = vpack.c.bf16 %v3329_v0, %v3327_v63  ;;  %v4009_v5 = vpack.c.bf16 %v3334_v3, %v3332_v2 }
0x1b8c   : > { %v3088_v7 = vmul.f32 %v3087_v6, %v3087_v6 }
0x1b8e   : > { %v3089_v8 = vsel %vm696_vm2, %v3088_v7, 0.0  ;;  %v3333_v7 = vld [vmem:[%s4737_s17 + $0x30] sm:$0xff] }
0x1b8f   : > { %3090 = vadd.xlane.f32.xlu1 %v3089_v8 }
0x1c1c   : > { %v3091_v13 = vpop.xlane.xlu1 %3090 }
0x1c1d   : > { %v3092_v15 = vmul.f32 0.03125, %v3091_v13  ;;  %v3589_v13 = vld [vmem:[%s4736_s16 + $0x1] ss:$0 sm:$0xff] }
0x1c1f   : > { %v3093_v16 = vadd.f32 1e-12, %v3092_v15 }
0x1c21   : > { %4079 = vrsqrt.f32 %v3093_v16 }
0x1c2b   : > { %v4080_v17 = vpop.eup %4079 }
0x1c2c   : > { %v3095_v19 = vmul.f32 %v4080_v17, %v3087_v6  ;;  %v3331_v6 = vld [vmem:[%s4737_s17 + $0x20] sm:$0xff]  ;;  %v3338_v17 = vshrl.u32 %v599_v28, 7 }
0x1c2d   : > { %v4011_v8 = vpack.c.bf16 %v3333_v7, %v3331_v6 }
0x1c2e   : > { %v3102_v21 = vmul.f32 %v3566_v18, %v3095_v19  ;;  %v3339_v18 = vsub.s32 0, %v3338_v17  ;;  %v3335_v19 = vld [vmem:[%s4738_s18] sm:$0x3] }
0x1c30   : > { %v3109_v22 = vadd.f32 %v3567_v20, %v3102_v21  ;;  %v3343_v20 = vsub.s32 1, %v3338_v17  ;;  %v4109_v21 = vmov 1966171168   ;;  %v3340_v23 = vrot.slane %v3335_v19, %v3339_v18 }
0x1c32   : > { %3912 = vmatmul.mubr.msk.f32.vlgmr.msra.gmra.mrb[24].mxu0 %vm696_vm2, %v3109_v22  ;;  %v3344_v24 = vrot.slane %v3335_v19, %v3343_v20 }
0x1c33   : > { %3414 = vmatprep.mubr.f32.mxu0 %v4096_v14  ;;  %v3579_v14 = vld [vmem:[%s4733_s13 + $0x60] sm:$0xff]  ;;  %4008 = vmatpush1.bf16.msra.mxu0 %v4007_v1 }
0x1c34   : > { %v4000_v31 = vpack.c.bf16 %v3580_v30, %v3579_v14  ;;  %4010 = vmatprep.subr.bf16.mxu0 %v4009_v5 }
0x1c36   : > { %4001 = vmatpush3.bf16.msra.mxu1 %v4000_v31 }
0x1c37   : > { %4002 = vmatprep.subr.bf16.mxu1 %v4094_v4  ;;  %v3584_v4 = vld [vmem:[%s4734_s14 + $0x1] ss:$0 sm:$0xff]  ;;  %4012 = vmatpush1.bf16.msra.mxu0 %v4011_v8 }
0x1c3a   : > { %4004 = vmatpush3.bf16.msra.mxu1 %v4003_v56 }
0x1d05   : > { %v3192_v36 = vpop.f32.mrb[24].mxu0 }
0x1d06   : > { %v3193_v38 = vadd.f32 %v3573_v35, %v3192_v36  ;;  %v3913_v39 = vpop.f32.mrb[25].mxu0 }
0x1d08   : > { %v3197_v40 = vmul.f32 0.044715, %v3193_v38  ;;  %v3196_v46 = vmul.f32 0.5, %v3193_v38 }
0x1d0a   : > { %v3198_v41 = vmul.f32 %v3197_v40, %v3193_v38 }
0x1d0c   : > { %v3199_v42 = vmul.f32 %v3198_v41, %v3193_v38 }
0x1d0e   : > { %v3200_v43 = vadd.f32 %v3199_v42, %v3193_v38 }
0x1d10   : > { %v3201_v44 = vmul.f32 0.7978846, %v3200_v43 }
0x1d12   : > { %4081 = vtanh.f32 %v3201_v44 }
0x1d1c   : > { %v4082_v45 = vpop.eup %4081 }
0x1d1d   : > { %v3203_v47 = vadd.f32 1.0, %v4082_v45 }
0x1d1f   : > { %v3204_v48 = vmul.f32 %v3203_v47, %v3196_v46 }
0x1d21   : > { %3931 = vmatmul.mubr.msk.f32.vlgmr.msra.gmra.mrb[34].mxu1 %vm1917_vm4, %v3204_v48 }
0x1df4   : > { %v3291_v49 = vpop.f32.mrb[34].mxu1 }
0x1df5   : > { %v3292_v50 = vadd.f32 %v3584_v4, %v3291_v49  ;;  %v3932_v51 = vpop.f32.mrb[35].mxu1 }
0x1df7   : > { %v3295_v52 = vadd.f32 %v3292_v50, %v3109_v22  ;;  %v3425_v22 = vunpack.c.l.s4 %v4109_v21 }
0x1df9   : > { %v3300_v53 = vsel %vm696_vm2, %v3295_v52, 0.0  ;;  %v3426_v25 = vunpack.c.0.s8 %v3425_v22 }
0x1dfa   : > { %3301 = vadd.xlane.f32.xlu1 %v3300_v53 }
0x1dfb   : > { %v3429_v30 = vsub.s32 %v3426_v25, %v3338_v17 }
0x1e87   : > { %v3302_v54 = vpop.xlane.xlu1 %3301 }
0x1e88   : > { %v3303_v55 = vmul.f32 0.03125, %v3302_v54 }
0x1e8a   : > { %v3304_v57 = vsub.f32 %v3295_v52, %v3303_v55 }
0x1e8c   : > { %v3305_v37 = vmul.f32 %v3304_v57, %v3304_v57 }
0x1e8e   : > { %v3306_v58 = vsel %vm696_vm2, %v3305_v37, 0.0 }
0x1e8f   : > { %3307 = vadd.xlane.f32.xlu1 %v3306_v58 }
0x1f1c   : > { %v3308_v9 = vpop.xlane.xlu1 %3307 }
0x1f1d   : > { %v3309_v59 = vmul.f32 0.03125, %v3308_v9 }
0x1f1f   : > { %v3310_v10 = vadd.f32 1e-12, %v3309_v59 }
0x1f21   : > { %4083 = vrsqrt.f32 %v3310_v10 }
0x1f2b   : > { %v4084_v34 = vpop.eup %4083 }
0x1f2c   : > { %v3312_v12 = vmul.f32 %v4084_v34, %v3304_v57 }
0x1f2e   : > { %v3319_v15 = vmul.f32 %v3588_v11, %v3312_v12 }
0x1f30   : > { %v3326_v16 = vadd.f32 %v3589_v13, %v3319_v15 }
0x1f32   : > { %3590 = vmatmul.mubr.msk.f32.vlgmr.msra.gmra.mrb[26].mxu0 %vm696_vm2, %v3326_v16 }
0x2005   : > { %v3416_v26 = vpop.f32.mrb[26].mxu0 }
0x2006   : > { %v3417_v27 = vadd.f32 %v3416_v26, %v3340_v23  ;;  %v3418_v29 = vpop.f32.mrb[27].mxu0 }
0x2007   : > { %v3419_v14 = vadd.f32 %v3418_v29, %v3344_v24 }
0x2009   : > { %v3423_v31 = vcombine.low %v3417_v27, %v3419_v14 }
0x200b   : > { %v3430_v32 = vrot.slane %v3423_v31, %v3429_v30 }
0x200d   : > { %v3437_v33 = vrot.slane %v3430_v32, %v3429_v30 }
0x200f   : > { %3443 = vst.msk [vmem:[%s597_s21] sm:$0x3] %vm3441_vm5, %v3437_v33 }
0x2010 PF: > { %s29_s0 = sadd.s32 1, %s4091_s0  }
0x2011   : > { %p26_p4 = scmp.ge.s32.totalorder %s29_s0, 4  }
0x2013   :  { %28 = sbr.rel (!%p26_p4) target bundleno = 5 (0x5), region = 138 }

</bundles_post_ra>
